<compile_context>
chip_gen: v6e
topology: v6e:2x2x1
jax: 0.10.0
libtpu: 0.0.40
codegen_flags: <defaults>
</compile_context>

<pallas_src>
import functools

import numpy as np
import jax
import jax.numpy as jnp
from jax.experimental import pallas as pl
from jax.experimental.pallas import tpu as pltpu


VMEM_LIMIT_BYTES = 48 * 1024 * 1024   # fits v7x (64 MiB physical) and below


def _compiler_params(dim_sem):
    return pltpu.CompilerParams(dimension_semantics=dim_sem,
                                vmem_limit_bytes=VMEM_LIMIT_BYTES)


def _pick_s_tile(S, max_tile=8192):
    """Largest multiple-of-128 divisor of S up to max_tile (falls back to S)."""
    if S <= max_tile or S % 128 != 0:
        return S
    for t in range(max_tile - max_tile % 128, 127, -128):
        if S % t == 0:
            return t
    return S


# --------------------------------------------------------------------------
# Pallas kernels
# --------------------------------------------------------------------------
def conv_in_prelu_kernel(*refs, add_residual):
    """Fused 1x1 conv + InstanceNorm2d(affine) + PReLU (+ optional residual).

    One batch element per grid step.  Activations are [C, S] with the long
    spatial axis S = F*T on the lane axis (lane-dense loads/stores)."""
    if add_residual:
        x_ref, r_ref, w_ref, b_ref, g_ref, be_ref, a_ref, o_ref = refs
    else:
        x_ref, w_ref, b_ref, g_ref, be_ref, a_ref, o_ref = refs
        r_ref = None

    x = x_ref[0]                                                   # [Cin, S]
    y = jnp.dot(w_ref[...], x, preferred_element_type=jnp.float32) + b_ref[...]
    mean = jnp.mean(y, axis=-1, keepdims=True)
    yc = y - mean
    var = jnp.mean(yc * yc, axis=-1, keepdims=True)                # biased (PyTorch IN)
    yn = yc * jax.lax.rsqrt(var + 1e-5)
    yn = yn * g_ref[...] + be_ref[...]                             # affine
    out = jnp.where(yn >= 0.0, yn, a_ref[...] * yn)                # PReLU
    if add_residual:
        out = out + r_ref[0]
    o_ref[0] = out


def mha_head_kernel(x_ref, pe_ref, wq_ref, wk_ref, wv_ref,
                    bq_ref, bk_ref, bv_ref, wo_ref, bo_ref, o_ref, *, scale):
    """One (batch, head) step of batch_first multi-head self-attention.

    Heads form a reduction grid axis: each step computes one head and
    accumulates its output-projection contribution into the resident output
    block (no sub-lane per-head slices or concat inside the kernel)."""
    h = pl.program_id(1)
    x = x_ref[0] + pe_ref[...]                                     # [T, E]
    q = jnp.dot(x, wq_ref[0], preferred_element_type=jnp.float32) + bq_ref[0]
    k = jnp.dot(x, wk_ref[0], preferred_element_type=jnp.float32) + bk_ref[0]
    v = jnp.dot(x, wv_ref[0], preferred_element_type=jnp.float32) + bv_ref[0]

    # scores = (q * scale) @ k.T   (contract the head dim of both)
    s = jax.lax.dot_general(q * scale, k, (((1,), (1,)), ((), ())),
                            preferred_element_type=jnp.float32)    # [T, T]
    s = s - jnp.max(s, axis=-1, keepdims=True)
    p = jnp.exp(s)
    p = p * pl.reciprocal(jnp.sum(p, axis=-1, keepdims=True), approx=True)
    # TODO(synk): for very long T, tile over keys with an online softmax
    # (flash-style) instead of materializing the full [T, T] scores.

    oh = jnp.dot(p, v, preferred_element_type=jnp.float32)         # [T, hd]
    contrib = jnp.dot(oh, wo_ref[0], preferred_element_type=jnp.float32)  # [T, E]

    @pl.when(h == 0)
    def _():
        o_ref[0] = jnp.broadcast_to(bo_ref[...], contrib.shape)

    o_ref[0] += contrib


def decoder_mask_kernel(x_ref, mag_ref, mw_ref, mb_ref, pw_ref, pb_ref,
                        dmag_ref, dpha_ref, cr_ref, ci_ref):
    """Fused mag/pha 1x1 decoders + mask multiply + complex reconstruction."""
    x = x_ref[0]                                                   # [H, Stile]
    mask = jnp.sum(mw_ref[...] * x, axis=0, keepdims=True) + mb_ref[...]  # [1, Stile]
    pha = jnp.sum(pw_ref[...] * x, axis=0, keepdims=True) + pb_ref[...]
    dmag = mask * mag_ref[0]
    dmag_ref[0] = dmag
    dpha_ref[0] = pha
    cr_ref[0] = dmag * jnp.cos(pha)
    ci_ref[0] = dmag * jnp.sin(pha)


# --------------------------------------------------------------------------
# Pallas wrappers
# --------------------------------------------------------------------------
def conv_in_prelu(x_bcs, w, b, gamma, beta, alpha, residual=None):
    """Fused pointwise conv + InstanceNorm(affine) + PReLU (+ residual).

    x_bcs: [B, Cin, S],  w: [Cout, Cin],  b/gamma/beta/alpha: [Cout]."""
    B, Cin, S = x_bcs.shape
    Cout = w.shape[0]
    kern = functools.partial(conv_in_prelu_kernel,
                             add_residual=residual is not None)

    in_specs = [pl.BlockSpec((1, Cin, S), lambda bi: (bi, 0, 0))]
    args = [x_bcs]
    if residual is not None:
        in_specs.append(pl.BlockSpec((1, Cout, S), lambda bi: (bi, 0, 0)))
        args.append(residual)
    par_spec = pl.BlockSpec((Cout, 1), lambda bi: (0, 0))
    in_specs += [pl.BlockSpec((Cout, Cin), lambda bi: (0, 0)),
                 par_spec, par_spec, par_spec, par_spec]
    args += [w, b.reshape(Cout, 1), gamma.reshape(Cout, 1),
             beta.reshape(Cout, 1), alpha.reshape(Cout, 1)]

    # TODO(synk): for very large S the per-batch block should switch to a
    # two-pass (stats then normalize) S-tiled pipeline to cap VMEM.
    return pl.pallas_call(
        kern,
        grid=(B,),
        in_specs=in_specs,
        out_specs=pl.BlockSpec((1, Cout, S), lambda bi: (bi, 0, 0)),
        out_shape=jax.ShapeDtypeStruct((B, Cout, S), jnp.float32),
        compiler_params=_compiler_params(("parallel",)),
    )(*args)


def multihead_attention(x_bte, pe_te, p, num_heads):
    """nn.MultiheadAttention(batch_first=True) self-attention."""
    B, T, E = x_bte.shape
    hd = E // num_heads
    scale = 1.0 / float(np.sqrt(hd))

    # Pre-split per-head weights OUTSIDE the kernel (cheap, one-time JAX ops).
    wq_h = p["wq"].reshape(E, num_heads, hd).transpose(1, 0, 2)    # [H, E, hd]
    wk_h = p["wk"].reshape(E, num_heads, hd).transpose(1, 0, 2)
    wv_h = p["wv"].reshape(E, num_heads, hd).transpose(1, 0, 2)
    bq_h = p["bq"].reshape(num_heads, 1, hd)
    bk_h = p["bk"].reshape(num_heads, 1, hd)
    bv_h = p["bv"].reshape(num_heads, 1, hd)
    wo_h = p["wo"].reshape(num_heads, hd, E)                       # [H, hd, E]
    bo = p["bo"]                                                   # [1, E]

    kern = functools.partial(mha_head_kernel, scale=scale)
    w_spec = pl.BlockSpec((1, E, hd), lambda b, h: (h, 0, 0))
    b_spec = pl.BlockSpec((1, 1, hd), lambda b, h: (h, 0, 0))
    return pl.pallas_call(
        kern,
        grid=(B, num_heads),
        in_specs=[
            pl.BlockSpec((1, T, E), lambda b, h: (b, 0, 0)),       # tokens
            pl.BlockSpec((T, E), lambda b, h: (0, 0)),             # positional emb
            w_spec, w_spec, w_spec,                                # wq, wk, wv (per head)
            b_spec, b_spec, b_spec,                                # bq, bk, bv (per head)
            pl.BlockSpec((1, hd, E), lambda b, h: (h, 0, 0)),      # wo (per-head rows)
            pl.BlockSpec((1, E), lambda b, h: (0, 0)),             # bo
        ],
        out_specs=pl.BlockSpec((1, T, E), lambda b, h: (b, 0, 0)),
        out_shape=jax.ShapeDtypeStruct((B, T, E), jnp.float32),
        compiler_params=_compiler_params(("parallel", "arbitrary")),
    )(x_bte, pe_te, wq_h, wk_h, wv_h, bq_h, bk_h, bv_h, wo_h, bo)


def decoder_mask(x_bhs, mag_flat, mag_w, mag_b, pha_w, pha_b):
    """Fused mag/pha decoders + mask*mag + complex (cos/sin) reconstruction."""
    B, H, S = x_bhs.shape
    s_tile = _pick_s_tile(S)
    n_s = S // s_tile

    act_spec = pl.BlockSpec((1, H, s_tile), lambda b, s: (b, 0, s))
    row_spec = pl.BlockSpec((1, 1, s_tile), lambda b, s: (b, 0, s))
    w_spec = pl.BlockSpec((H, 1), lambda b, s: (0, 0))
    b_spec = pl.BlockSpec((1, 1), lambda b, s: (0, 0))
    shp = jax.ShapeDtypeStruct((B, 1, S), jnp.float32)
    return pl.pallas_call(
        decoder_mask_kernel,
        grid=(B, n_s),
        in_specs=[act_spec, row_spec, w_spec, b_spec, w_spec, b_spec],
        out_specs=(row_spec, row_spec, row_spec, row_spec),
        out_shape=(shp, shp, shp, shp),
        compiler_params=_compiler_params(("parallel", "parallel")),
    )(x_bhs, mag_flat, mag_w, mag_b.reshape(1, 1), pha_w, pha_b.reshape(1, 1))


# --------------------------------------------------------------------------
# Positional embedding (Whisper sinusoids)
# --------------------------------------------------------------------------
def sinusoids_np(length, channels, max_timescale=10000):
    assert channels % 2 == 0
    log_timescale_increment = np.log(max_timescale) / (channels // 2 - 1)
    inv_timescales = np.exp(-log_timescale_increment * np.arange(channels // 2))
    scaled_time = np.arange(length)[:, None] * inv_timescales[None, :]
    return np.concatenate(
        [np.sin(scaled_time), np.cos(scaled_time)], axis=1
    ).astype(np.float32)


# --------------------------------------------------------------------------
# Deterministic parameter initialization
# --------------------------------------------------------------------------
def init_params(key, H, Cr, E):
    ks = jax.random.split(key, 24)
    n = lambda k, s, sc=0.1: (sc * jax.random.normal(k, s)).astype(jnp.float32)
    return {
        # TODO(synk): DenseEncoder definition not provided; stand-in =
        # Conv2d(2->H, k=1) + InstanceNorm2d(affine=True) + PReLU(H).
        "enc_w": n(ks[0], (H, 2)), "enc_b": n(ks[1], (H,)),
        "enc_g": 1.0 + n(ks[2], (H,)), "enc_be": n(ks[3], (H,)),
        "enc_a": jnp.full((H,), 0.25, jnp.float32),
        # reduce: Conv2d(H->Cr, k=1,s=1,p=0,g=1) + InstanceNorm2d(affine) + PReLU(Cr)
        "red_w": n(ks[4], (Cr, H)), "red_b": n(ks[5], (Cr,)),
        "red_g": 1.0 + n(ks[6], (Cr,)), "red_be": n(ks[7], (Cr,)),
        "red_a": jnp.full((Cr,), 0.25, jnp.float32),
        # MultiheadAttention (weights pre-transposed for x @ W)
        "attn": {
            "wq": n(ks[8], (E, E)), "wk": n(ks[9], (E, E)), "wv": n(ks[10], (E, E)),
            "bq": n(ks[11], (1, E)), "bk": n(ks[12], (1, E)), "bv": n(ks[13], (1, E)),
            "wo": n(ks[14], (E, E)), "bo": n(ks[15], (1, E)),
        },
        # expand: ConvTranspose2d(Cr->H, k=1) + InstanceNorm2d(affine) + PReLU(H)
        "exp_w": n(ks[16], (H, Cr)), "exp_b": n(ks[17], (H,)),
        "exp_g": 1.0 + n(ks[18], (H,)), "exp_be": n(ks[19], (H,)),
        "exp_a": jnp.full((H,), 0.25, jnp.float32),
        # TODO(synk): MagDecoder / PhaseDecoder definitions not provided;
        # stand-ins = Conv2d(H->1, k=1).
        "mag_w": n(ks[20], (H, 1)), "mag_b": n(ks[21], (1,)),
        "pha_w": n(ks[22], (H, 1)), "pha_b": n(ks[23], (1,)),
    }


# --------------------------------------------------------------------------
# Forward pass
# --------------------------------------------------------------------------
def semamba_code2dreat_forward(noisy_mag, noisy_pha, params, pe, *,
                               num_tfmamba=4, num_heads=4):
    B, F_dim, T = noisy_mag.shape
    S = F_dim * T
    # f-major flattening (s = f*T + t): input [B,F,T] and final outputs need
    # only free reshapes; pointwise conv / instance norm are order-agnostic.
    mag_flat = noisy_mag.reshape(B, 1, S)
    pha_flat = noisy_pha.reshape(B, 1, S)
    x = jnp.concatenate([mag_flat, pha_flat], axis=1)               # [B, 2, S]

    # dense encoder (stand-in): fused conv1x1 + IN + PReLU
    x = conv_in_prelu(x, params["enc_w"], params["enc_b"],
                      params["enc_g"], params["enc_be"], params["enc_a"])

    for block_i in range(num_tfmamba):
        if block_i == num_tfmamba // 2:
            # ---- attention branch (SEMambaCoDe2dReAt-specific) ----
            xr = conv_in_prelu(x, params["red_w"], params["red_b"],
                               params["red_g"], params["red_be"], params["red_a"])
            Cr = xr.shape[1]
            # 'b c t f -> b t (f c)'  (our spatial layout is [F, T])
            x_pre = jnp.transpose(xr.reshape(B, Cr, F_dim, T),
                                  (0, 3, 2, 1)).reshape(B, T, F_dim * Cr)

            # extend / slice positional embedding (added inside the MHA kernel)
            pe_use = pe
            if T > pe_use.shape[0]:
                rep = T // pe_use.shape[0] + 1
                pe_use = jnp.tile(pe_use, (rep, 1))
            pe_use = pe_use[:T, :]

            x_att = multihead_attention(x_pre, pe_use, params["attn"], num_heads)

            # 'b t (f c) -> b c t f'  -> [B, Cr, S]
            x_att = jnp.transpose(x_att.reshape(B, T, F_dim, Cr),
                                  (0, 3, 2, 1)).reshape(B, Cr, S)
            # expand (fused conv1x1 + IN + PReLU) with residual add in-kernel
            x = conv_in_prelu(x_att, params["exp_w"], params["exp_b"],
                              params["exp_g"], params["exp_be"], params["exp_a"],
                              residual=x)
        # TODO(synk): TFMambaBlock (Mamba SSM) definition not provided; identity.
        x = x

    dmag, dpha, cr, ci = decoder_mask(x, mag_flat, params["mag_w"],
                                      params["mag_b"], params["pha_w"],
                                      params["pha_b"])

    denoised_mag = dmag.reshape(B, F_dim, T)
    denoised_pha = dpha.reshape(B, F_dim, T)
    denoised_com = jnp.stack([cr.reshape(B, F_dim, T),
                              ci.reshape(B, F_dim, T)], axis=-1)   # [B, F, T, 2]
    return denoised_mag, denoised_pha, denoised_com


# --------------------------------------------------------------------------
if __name__ == "__main__":
    # synthetic cfg: hid_feature=8, num_tfmamba=4, reduce_out=4, heads=4,
    # kernel/stride=1, padding=0, groups=1, embed_dim = F * reduce_out = 64,
    # positional_encoding_len = 8
    B, F_dim, T = 2, 16, 8
    H, Cr, NUM_HEADS = 8, 4, 4
    E = F_dim * Cr
    PE_LEN = 8

    key = jax.random.PRNGKey(0)
    k_mag, k_pha, k_par = jax.random.split(key, 3)
    noisy_mag = jax.random.uniform(k_mag, (B, F_dim, T), jnp.float32)
    noisy_pha = jax.random.uniform(k_pha, (B, F_dim, T), jnp.float32,
                                   minval=-np.pi, maxval=np.pi)

    params = init_params(k_par, H, Cr, E)
    pe = jnp.asarray(sinusoids_np(PE_LEN, E))

    fwd = jax.jit(functools.partial(semamba_code2dreat_forward,
                                    num_tfmamba=4, num_heads=NUM_HEADS))
    dmag, dpha, dcom = fwd(noisy_mag, noisy_pha, params, pe)
    jax.block_until_ready((dmag, dpha, dcom))

    assert dmag.shape == (B, F_dim, T)
    assert dpha.shape == (B, F_dim, T)
    assert dcom.shape == (B, F_dim, T, 2)
    assert bool(jnp.all(jnp.isfinite(dmag)))
    assert bool(jnp.all(jnp.isfinite(dcom)))
    print("KERNEL_OK")
</pallas_src>

<mosaic_0001>
module attributes {stable_mosaic.version = 11 : i64} {
  func.func @conv_in_prelu_kernel(%arg0: i32, %arg1: memref<1x8x128xf32, #tpu.memory_space<vmem>>, %arg2: memref<4x8xf32, #tpu.memory_space<vmem>>, %arg3: memref<4x1xf32, #tpu.memory_space<vmem>>, %arg4: memref<4x1xf32, #tpu.memory_space<vmem>>, %arg5: memref<4x1xf32, #tpu.memory_space<vmem>>, %arg6: memref<4x1xf32, #tpu.memory_space<vmem>>, %arg7: memref<1x4x128xf32, #tpu.memory_space<vmem>>) attributes {dimension_semantics = [#tpu.dimension_semantics<parallel>], iteration_bounds = array<i64: 2>, scalar_prefetch = 0 : i64, scratch_operands = 0 : i64, tpu.core_type = #tpu.core_type<tc>, window_params = [{transform_indices = @transform_0, window_bounds = array<i64: 1, 8, 128>}, {pipeline_mode = #tpu.pipeline_mode<synchronous>, transform_indices = @transform_1, window_bounds = array<i64: 4, 8>}, {pipeline_mode = #tpu.pipeline_mode<synchronous>, transform_indices = @transform_2, window_bounds = array<i64: 4, 1>}, {pipeline_mode = #tpu.pipeline_mode<synchronous>, transform_indices = @transform_3, window_bounds = array<i64: 4, 1>}, {pipeline_mode = #tpu.pipeline_mode<synchronous>, transform_indices = @transform_4, window_bounds = array<i64: 4, 1>}, {pipeline_mode = #tpu.pipeline_mode<synchronous>, transform_indices = @transform_5, window_bounds = array<i64: 4, 1>}, {transform_indices = @transform_6, window_bounds = array<i64: 1, 4, 128>}]} {
    %c0 = arith.constant 0 : index
    %c0_0 = arith.constant 0 : index
    %c0_1 = arith.constant 0 : index
    %0 = vector.load %arg1[%c0, %c0_0, %c0_1] : memref<1x8x128xf32, #tpu.memory_space<vmem>>, vector<1x8x128xf32>
    %1 = vector.shape_cast %0 : vector<1x8x128xf32> to vector<8x128xf32>
    %c0_2 = arith.constant 0 : index
    %c0_3 = arith.constant 0 : index
    %2 = vector.load %arg2[%c0_2, %c0_3] : memref<4x8xf32, #tpu.memory_space<vmem>>, vector<4x8xf32>
    %cst = arith.constant dense<0.000000e+00> : vector<4x128xf32>
    %3 = tpu.matmul %2, %1, %cst {dimension_numbers = #tpu.dot_dimension_numbers<[1], [0], [0], [1], [0, 0, 1, 1], [], []>} : vector<4x8xf32>, vector<8x128xf32>, vector<4x128xf32> -> vector<4x128xf32>
    %c0_4 = arith.constant 0 : index
    %c0_5 = arith.constant 0 : index
    %4 = vector.load %arg3[%c0_4, %c0_5] : memref<4x1xf32, #tpu.memory_space<vmem>>, vector<4x1xf32>
    %5 = vector.broadcast %4 : vector<4x1xf32> to vector<4x128xf32>
    %6 = arith.addf %3, %5 : vector<4x128xf32>
    %cst_6 = arith.constant dense<0.000000e+00> : vector<4xf32>
    %7 = vector.multi_reduction <add>, %6, %cst_6 [1] : vector<4x128xf32> to vector<4xf32>
    %8 = vector.shape_cast %7 : vector<4xf32> to vector<4x1xf32>
    %cst_7 = arith.constant 1.280000e+02 : f32
    %9 = vector.broadcast %cst_7 : f32 to vector<4x1xf32>
    %10 = arith.divf %8, %9 : vector<4x1xf32>
    %11 = vector.broadcast %10 : vector<4x1xf32> to vector<4x128xf32>
    %12 = arith.subf %6, %11 : vector<4x128xf32>
    %13 = arith.mulf %12, %12 : vector<4x128xf32>
    %cst_8 = arith.constant dense<0.000000e+00> : vector<4xf32>
    %14 = vector.multi_reduction <add>, %13, %cst_8 [1] : vector<4x128xf32> to vector<4xf32>
    %15 = vector.shape_cast %14 : vector<4xf32> to vector<4x1xf32>
    %cst_9 = arith.constant 1.280000e+02 : f32
    %16 = vector.broadcast %cst_9 : f32 to vector<4x1xf32>
    %17 = arith.divf %15, %16 : vector<4x1xf32>
    %cst_10 = arith.constant 9.99999974E-6 : f32
    %18 = vector.broadcast %cst_10 : f32 to vector<4x1xf32>
    %19 = arith.addf %17, %18 : vector<4x1xf32>
    %20 = math.rsqrt %19 : vector<4x1xf32>
    %21 = vector.broadcast %20 : vector<4x1xf32> to vector<4x128xf32>
    %22 = arith.mulf %12, %21 : vector<4x128xf32>
    %c0_11 = arith.constant 0 : index
    %c0_12 = arith.constant 0 : index
    %23 = vector.load %arg4[%c0_11, %c0_12] : memref<4x1xf32, #tpu.memory_space<vmem>>, vector<4x1xf32>
    %24 = vector.broadcast %23 : vector<4x1xf32> to vector<4x128xf32>
    %25 = arith.mulf %22, %24 : vector<4x128xf32>
    %c0_13 = arith.constant 0 : index
    %c0_14 = arith.constant 0 : index
    %26 = vector.load %arg5[%c0_13, %c0_14] : memref<4x1xf32, #tpu.memory_space<vmem>>, vector<4x1xf32>
    %27 = vector.broadcast %26 : vector<4x1xf32> to vector<4x128xf32>
    %28 = arith.addf %25, %27 : vector<4x128xf32>
    %cst_15 = arith.constant 0.000000e+00 : f32
    %29 = vector.broadcast %cst_15 : f32 to vector<4x128xf32>
    %30 = arith.cmpf oge, %28, %29 : vector<4x128xf32>
    %c0_16 = arith.constant 0 : index
    %c0_17 = arith.constant 0 : index
    %31 = vector.load %arg6[%c0_16, %c0_17] : memref<4x1xf32, #tpu.memory_space<vmem>>, vector<4x1xf32>
    %32 = vector.broadcast %31 : vector<4x1xf32> to vector<4x128xf32>
    %33 = arith.mulf %32, %28 : vector<4x128xf32>
    %34 = arith.select %30, %28, %33 : vector<4x128xi1>, vector<4x128xf32>
    %c0_18 = arith.constant 0 : index
    %c0_19 = arith.constant 0 : index
    %c0_20 = arith.constant 0 : index
    %35 = vector.load %arg7[%c0_18, %c0_19, %c0_20] : memref<1x4x128xf32, #tpu.memory_space<vmem>>, vector<1x4x128xf32>
    %36 = vector.shape_cast %35 : vector<1x4x128xf32> to vector<4x128xf32>
    %37 = vector.shape_cast %34 : vector<4x128xf32> to vector<1x4x128xf32>
    tpu.vector_store %arg7[%c0_18, %c0_19, %c0_20], %37 {strides = array<i32>} : memref<1x4x128xf32, #tpu.memory_space<vmem>>, vector<1x4x128xf32>,
    return
  }
  func.func @transform_0(%arg0: i32) -> (i32, i32, i32) {
    %c0_i32 = arith.constant 0 : i32
    %c0_i32_0 = arith.constant 0 : i32
    %c0_i32_1 = arith.constant 0 : i32
    return %arg0, %c0_i32, %c0_i32_0 : i32, i32, i32
  }
  func.func @transform_1(%arg0: i32) -> (i32, i32) {
    %c0_i32 = arith.constant 0 : i32
    %c0_i32_0 = arith.constant 0 : i32
    %c0_i32_1 = arith.constant 0 : i32
    return %c0_i32, %c0_i32_0 : i32, i32
  }
  func.func @transform_2(%arg0: i32) -> (i32, i32) {
    %c0_i32 = arith.constant 0 : i32
    %c0_i32_0 = arith.constant 0 : i32
    %c0_i32_1 = arith.constant 0 : i32
    return %c0_i32, %c0_i32_0 : i32, i32
  }
  func.func @transform_3(%arg0: i32) -> (i32, i32) {
    %c0_i32 = arith.constant 0 : i32
    %c0_i32_0 = arith.constant 0 : i32
    %c0_i32_1 = arith.constant 0 : i32
    return %c0_i32, %c0_i32_0 : i32, i32
  }
  func.func @transform_4(%arg0: i32) -> (i32, i32) {
    %c0_i32 = arith.constant 0 : i32
    %c0_i32_0 = arith.constant 0 : i32
    %c0_i32_1 = arith.constant 0 : i32
    return %c0_i32, %c0_i32_0 : i32, i32
  }
  func.func @transform_5(%arg0: i32) -> (i32, i32) {
    %c0_i32 = arith.constant 0 : i32
    %c0_i32_0 = arith.constant 0 : i32
    %c0_i32_1 = arith.constant 0 : i32
    return %c0_i32, %c0_i32_0 : i32, i32
  }
  func.func @transform_6(%arg0: i32) -> (i32, i32, i32) {
    %c0_i32 = arith.constant 0 : i32
    %c0_i32_0 = arith.constant 0 : i32
    %c0_i32_1 = arith.constant 0 : i32
    return %arg0, %c0_i32, %c0_i32_0 : i32, i32, i32
  }
}

module attributes {stable_mosaic.version = 11 : i64} {
  func.func @conv_in_prelu_kernel(%arg0: i32, %arg1: memref<1x2x128xf32, #tpu.memory_space<vmem>>, %arg2: memref<8x2xf32, #tpu.memory_space<vmem>>, %arg3: memref<8x1xf32, #tpu.memory_space<vmem>>, %arg4: memref<8x1xf32, #tpu.memory_space<vmem>>, %arg5: memref<8x1xf32, #tpu.memory_space<vmem>>, %arg6: memref<8x1xf32, #tpu.memory_space<vmem>>, %arg7: memref<1x8x128xf32, #tpu.memory_space<vmem>>) attributes {dimension_semantics = [#tpu.dimension_semantics<parallel>], iteration_bounds = array<i64: 2>, scalar_prefetch = 0 : i64, scratch_operands = 0 : i64, tpu.core_type = #tpu.core_type<tc>, window_params = [{transform_indices = @transform_0, window_bounds = array<i64: 1, 2, 128>}, {pipeline_mode = #tpu.pipeline_mode<synchronous>, transform_indices = @transform_1, window_bounds = array<i64: 8, 2>}, {pipeline_mode = #tpu.pipeline_mode<synchronous>, transform_indices = @transform_2, window_bounds = array<i64: 8, 1>}, {pipeline_mode = #tpu.pipeline_mode<synchronous>, transform_indices = @transform_3, window_bounds = array<i64: 8, 1>}, {pipeline_mode = #tpu.pipeline_mode<synchronous>, transform_indices = @transform_4, window_bounds = array<i64: 8, 1>}, {pipeline_mode = #tpu.pipeline_mode<synchronous>, transform_indices = @transform_5, window_bounds = array<i64: 8, 1>}, {transform_indices = @transform_6, window_bounds = array<i64: 1, 8, 128>}]} {
    %c0 = arith.constant 0 : index
    %c0_0 = arith.constant 0 : index
    %c0_1 = arith.constant 0 : index
    %0 = vector.load %arg1[%c0, %c0_0, %c0_1] : memref<1x2x128xf32, #tpu.memory_space<vmem>>, vector<1x2x128xf32>
    %1 = vector.shape_cast %0 : vector<1x2x128xf32> to vector<2x128xf32>
    %c0_2 = arith.constant 0 : index
    %c0_3 = arith.constant 0 : index
    %2 = vector.load %arg2[%c0_2, %c0_3] : memref<8x2xf32, #tpu.memory_space<vmem>>, vector<8x2xf32>
    %cst = arith.constant dense<0.000000e+00> : vector<8x128xf32>
    %3 = tpu.matmul %2, %1, %cst {dimension_numbers = #tpu.dot_dimension_numbers<[1], [0], [0], [1], [0, 0, 1, 1], [], []>} : vector<8x2xf32>, vector<2x128xf32>, vector<8x128xf32> -> vector<8x128xf32>
    %c0_4 = arith.constant 0 : index
    %c0_5 = arith.constant 0 : index
    %4 = vector.load %arg3[%c0_4, %c0_5] : memref<8x1xf32, #tpu.memory_space<vmem>>, vector<8x1xf32>
    %5 = vector.broadcast %4 : vector<8x1xf32> to vector<8x128xf32>
    %6 = arith.addf %3, %5 : vector<8x128xf32>
    %cst_6 = arith.constant dense<0.000000e+00> : vector<8xf32>
    %7 = vector.multi_reduction <add>, %6, %cst_6 [1] : vector<8x128xf32> to vector<8xf32>
    %8 = vector.shape_cast %7 : vector<8xf32> to vector<8x1xf32>
    %cst_7 = arith.constant 1.280000e+02 : f32
    %9 = vector.broadcast %cst_7 : f32 to vector<8x1xf32>
    %10 = arith.divf %8, %9 : vector<8x1xf32>
    %11 = vector.broadcast %10 : vector<8x1xf32> to vector<8x128xf32>
    %12 = arith.subf %6, %11 : vector<8x128xf32>
    %13 = arith.mulf %12, %12 : vector<8x128xf32>
    %cst_8 = arith.constant dense<0.000000e+00> : vector<8xf32>
    %14 = vector.multi_reduction <add>, %13, %cst_8 [1] : vector<8x128xf32> to vector<8xf32>
    %15 = vector.shape_cast %14 : vector<8xf32> to vector<8x1xf32>
    %cst_9 = arith.constant 1.280000e+02 : f32
    %16 = vector.broadcast %cst_9 : f32 to vector<8x1xf32>
    %17 = arith.divf %15, %16 : vector<8x1xf32>
    %cst_10 = arith.constant 9.99999974E-6 : f32
    %18 = vector.broadcast %cst_10 : f32 to vector<8x1xf32>
    %19 = arith.addf %17, %18 : vector<8x1xf32>
    %20 = math.rsqrt %19 : vector<8x1xf32>
    %21 = vector.broadcast %20 : vector<8x1xf32> to vector<8x128xf32>
    %22 = arith.mulf %12, %21 : vector<8x128xf32>
    %c0_11 = arith.constant 0 : index
    %c0_12 = arith.constant 0 : index
    %23 = vector.load %arg4[%c0_11, %c0_12] : memref<8x1xf32, #tpu.memory_space<vmem>>, vector<8x1xf32>
    %24 = vector.broadcast %23 : vector<8x1xf32> to vector<8x128xf32>
    %25 = arith.mulf %22, %24 : vector<8x128xf32>
    %c0_13 = arith.constant 0 : index
    %c0_14 = arith.constant 0 : index
    %26 = vector.load %arg5[%c0_13, %c0_14] : memref<8x1xf32, #tpu.memory_space<vmem>>, vector<8x1xf32>
    %27 = vector.broadcast %26 : vector<8x1xf32> to vector<8x128xf32>
    %28 = arith.addf %25, %27 : vector<8x128xf32>
    %cst_15 = arith.constant 0.000000e+00 : f32
    %29 = vector.broadcast %cst_15 : f32 to vector<8x128xf32>
    %30 = arith.cmpf oge, %28, %29 : vector<8x128xf32>
    %c0_16 = arith.constant 0 : index
    %c0_17 = arith.constant 0 : index
    %31 = vector.load %arg6[%c0_16, %c0_17] : memref<8x1xf32, #tpu.memory_space<vmem>>, vector<8x1xf32>
    %32 = vector.broadcast %31 : vector<8x1xf32> to vector<8x128xf32>
    %33 = arith.mulf %32, %28 : vector<8x128xf32>
    %34 = arith.select %30, %28, %33 : vector<8x128xi1>, vector<8x128xf32>
    %c0_18 = arith.constant 0 : index
    %c0_19 = arith.constant 0 : index
    %c0_20 = arith.constant 0 : index
    %35 = vector.load %arg7[%c0_18, %c0_19, %c0_20] : memref<1x8x128xf32, #tpu.memory_space<vmem>>, vector<1x8x128xf32>
    %36 = vector.shape_cast %35 : vector<1x8x128xf32> to vector<8x128xf32>
    %37 = vector.shape_cast %34 : vector<8x128xf32> to vector<1x8x128xf32>
    tpu.vector_store %arg7[%c0_18, %c0_19, %c0_20], %37 {strides = array<i32>} : memref<1x8x128xf32, #tpu.memory_space<vmem>>, vector<1x8x128xf32>,
    return
  }
  func.func @transform_0(%arg0: i32) -> (i32, i32, i32) {
    %c0_i32 = arith.constant 0 : i32
    %c0_i32_0 = arith.constant 0 : i32
    %c0_i32_1 = arith.constant 0 : i32
    return %arg0, %c0_i32, %c0_i32_0 : i32, i32, i32
  }
  func.func @transform_1(%arg0: i32) -> (i32, i32) {
    %c0_i32 = arith.constant 0 : i32
    %c0_i32_0 = arith.constant 0 : i32
    %c0_i32_1 = arith.constant 0 : i32
    return %c0_i32, %c0_i32_0 : i32, i32
  }
  func.func @transform_2(%arg0: i32) -> (i32, i32) {
    %c0_i32 = arith.constant 0 : i32
    %c0_i32_0 = arith.constant 0 : i32
    %c0_i32_1 = arith.constant 0 : i32
    return %c0_i32, %c0_i32_0 : i32, i32
  }
  func.func @transform_3(%arg0: i32) -> (i32, i32) {
    %c0_i32 = arith.constant 0 : i32
    %c0_i32_0 = arith.constant 0 : i32
    %c0_i32_1 = arith.constant 0 : i32
    return %c0_i32, %c0_i32_0 : i32, i32
  }
  func.func @transform_4(%arg0: i32) -> (i32, i32) {
    %c0_i32 = arith.constant 0 : i32
    %c0_i32_0 = arith.constant 0 : i32
    %c0_i32_1 = arith.constant 0 : i32
    return %c0_i32, %c0_i32_0 : i32, i32
  }
  func.func @transform_5(%arg0: i32) -> (i32, i32) {
    %c0_i32 = arith.constant 0 : i32
    %c0_i32_0 = arith.constant 0 : i32
    %c0_i32_1 = arith.constant 0 : i32
    return %c0_i32, %c0_i32_0 : i32, i32
  }
  func.func @transform_6(%arg0: i32) -> (i32, i32, i32) {
    %c0_i32 = arith.constant 0 : i32
    %c0_i32_0 = arith.constant 0 : i32
    %c0_i32_1 = arith.constant 0 : i32
    return %arg0, %c0_i32, %c0_i32_0 : i32, i32, i32
  }
}

module attributes {stable_mosaic.version = 11 : i64} {
  func.func @mha_head_kernel(%arg0: i32, %arg1: i32, %arg2: memref<1x8x64xf32, #tpu.memory_space<vmem>>, %arg3: memref<8x64xf32, #tpu.memory_space<vmem>>, %arg4: memref<1x64x16xf32, #tpu.memory_space<vmem>>, %arg5: memref<1x64x16xf32, #tpu.memory_space<vmem>>, %arg6: memref<1x64x16xf32, #tpu.memory_space<vmem>>, %arg7: memref<1x1x16xf32, #tpu.memory_space<vmem>>, %arg8: memref<1x1x16xf32, #tpu.memory_space<vmem>>, %arg9: memref<1x1x16xf32, #tpu.memory_space<vmem>>, %arg10: memref<1x16x64xf32, #tpu.memory_space<vmem>>, %arg11: memref<1x64xf32, #tpu.memory_space<vmem>>, %arg12: memref<1x8x64xf32, #tpu.memory_space<vmem>>) attributes {dimension_semantics = [#tpu.dimension_semantics<parallel>, #tpu.dimension_semantics<arbitrary>], iteration_bounds = array<i64: 2, 4>, scalar_prefetch = 0 : i64, scratch_operands = 0 : i64, tpu.core_type = #tpu.core_type<tc>, window_params = [{transform_indices = @transform_0, window_bounds = array<i64: 1, 8, 64>}, {pipeline_mode = #tpu.pipeline_mode<synchronous>, transform_indices = @transform_1, window_bounds = array<i64: 8, 64>}, {transform_indices = @transform_2, window_bounds = array<i64: 1, 64, 16>}, {transform_indices = @transform_3, window_bounds = array<i64: 1, 64, 16>}, {transform_indices = @transform_4, window_bounds = array<i64: 1, 64, 16>}, {transform_indices = @transform_5, window_bounds = array<i64: 1, 1, 16>}, {transform_indices = @transform_6, window_bounds = array<i64: 1, 1, 16>}, {transform_indices = @transform_7, window_bounds = array<i64: 1, 1, 16>}, {transform_indices = @transform_8, window_bounds = array<i64: 1, 16, 64>}, {pipeline_mode = #tpu.pipeline_mode<synchronous>, transform_indices = @transform_9, window_bounds = array<i64: 1, 64>}, {transform_indices = @transform_10, window_bounds = array<i64: 1, 8, 64>}]} {
    %c0 = arith.constant 0 : index
    %c0_0 = arith.constant 0 : index
    %c0_1 = arith.constant 0 : index
    %0 = vector.load %arg2[%c0, %c0_0, %c0_1] : memref<1x8x64xf32, #tpu.memory_space<vmem>>, vector<1x8x64xf32>
    %1 = vector.shape_cast %0 : vector<1x8x64xf32> to vector<8x64xf32>
    %c0_2 = arith.constant 0 : index
    %c0_3 = arith.constant 0 : index
    %2 = vector.load %arg3[%c0_2, %c0_3] : memref<8x64xf32, #tpu.memory_space<vmem>>, vector<8x64xf32>
    %3 = arith.addf %1, %2 : vector<8x64xf32>
    %c0_4 = arith.constant 0 : index
    %c0_5 = arith.constant 0 : index
    %c0_6 = arith.constant 0 : index
    %4 = vector.load %arg4[%c0_4, %c0_5, %c0_6] : memref<1x64x16xf32, #tpu.memory_space<vmem>>, vector<1x64x16xf32>
    %5 = vector.shape_cast %4 : vector<1x64x16xf32> to vector<64x16xf32>
    %cst = arith.constant dense<0.000000e+00> : vector<8x16xf32>
    %6 = tpu.matmul %3, %5, %cst {dimension_numbers = #tpu.dot_dimension_numbers<[1], [0], [0], [1], [0, 0, 1, 1], [], []>} : vector<8x64xf32>, vector<64x16xf32>, vector<8x16xf32> -> vector<8x16xf32>
    %c0_7 = arith.constant 0 : index
    %c0_8 = arith.constant 0 : index
    %c0_9 = arith.constant 0 : index
    %7 = vector.load %arg7[%c0_7, %c0_8, %c0_9] : memref<1x1x16xf32, #tpu.memory_space<vmem>>, vector<1x1x16xf32>
    %8 = vector.shape_cast %7 : vector<1x1x16xf32> to vector<1x16xf32>
    %9 = vector.broadcast %8 : vector<1x16xf32> to vector<8x16xf32>
    %10 = arith.addf %6, %9 : vector<8x16xf32>
    %c0_10 = arith.constant 0 : index
    %c0_11 = arith.constant 0 : index
    %c0_12 = arith.constant 0 : index
    %11 = vector.load %arg5[%c0_10, %c0_11, %c0_12] : memref<1x64x16xf32, #tpu.memory_space<vmem>>, vector<1x64x16xf32>
    %12 = vector.shape_cast %11 : vector<1x64x16xf32> to vector<64x16xf32>
    %cst_13 = arith.constant dense<0.000000e+00> : vector<8x16xf32>
    %13 = tpu.matmul %3, %12, %cst_13 {dimension_numbers = #tpu.dot_dimension_numbers<[1], [0], [0], [1], [0, 0, 1, 1], [], []>} : vector<8x64xf32>, vector<64x16xf32>, vector<8x16xf32> -> vector<8x16xf32>
    %c0_14 = arith.constant 0 : index
    %c0_15 = arith.constant 0 : index
    %c0_16 = arith.constant 0 : index
    %14 = vector.load %arg8[%c0_14, %c0_15, %c0_16] : memref<1x1x16xf32, #tpu.memory_space<vmem>>, vector<1x1x16xf32>
    %15 = vector.shape_cast %14 : vector<1x1x16xf32> to vector<1x16xf32>
    %16 = vector.broadcast %15 : vector<1x16xf32> to vector<8x16xf32>
    %17 = arith.addf %13, %16 : vector<8x16xf32>
    %c0_17 = arith.constant 0 : index
    %c0_18 = arith.constant 0 : index
    %c0_19 = arith.constant 0 : index
    %18 = vector.load %arg6[%c0_17, %c0_18, %c0_19] : memref<1x64x16xf32, #tpu.memory_space<vmem>>, vector<1x64x16xf32>
    %19 = vector.shape_cast %18 : vector<1x64x16xf32> to vector<64x16xf32>
    %cst_20 = arith.constant dense<0.000000e+00> : vector<8x16xf32>
    %20 = tpu.matmul %3, %19, %cst_20 {dimension_numbers = #tpu.dot_dimension_numbers<[1], [0], [0], [1], [0, 0, 1, 1], [], []>} : vector<8x64xf32>, vector<64x16xf32>, vector<8x16xf32> -> vector<8x16xf32>
    %c0_21 = arith.constant 0 : index
    %c0_22 = arith.constant 0 : index
    %c0_23 = arith.constant 0 : index
    %21 = vector.load %arg9[%c0_21, %c0_22, %c0_23] : memref<1x1x16xf32, #tpu.memory_space<vmem>>, vector<1x1x16xf32>
    %22 = vector.shape_cast %21 : vector<1x1x16xf32> to vector<1x16xf32>
    %23 = vector.broadcast %22 : vector<1x16xf32> to vector<8x16xf32>
    %24 = arith.addf %20, %23 : vector<8x16xf32>
    %cst_24 = arith.constant 2.500000e-01 : f32
    %25 = vector.broadcast %cst_24 : f32 to vector<8x16xf32>
    %26 = arith.mulf %10, %25 : vector<8x16xf32>
    %cst_25 = arith.constant dense<0.000000e+00> : vector<8x8xf32>
    %27 = tpu.matmul %26, %17, %cst_25 {dimension_numbers = #tpu.dot_dimension_numbers<[1], [1], [0], [0], [0, 0, 1, 0], [], []>} : vector<8x16xf32>, vector<8x16xf32>, vector<8x8xf32> -> vector<8x8xf32>
    %cst_26 = arith.constant dense<0xFF800000> : vector<8xf32>
    %28 = vector.multi_reduction <maximumf>, %27, %cst_26 [1] : vector<8x8xf32> to vector<8xf32>
    %29 = vector.shape_cast %28 : vector<8xf32> to vector<8x1xf32>
    %30 = vector.broadcast %29 : vector<8x1xf32> to vector<8x8xf32>
    %31 = arith.subf %27, %30 : vector<8x8xf32>
    %32 = math.exp %31 : vector<8x8xf32>
    %cst_27 = arith.constant dense<0.000000e+00> : vector<8xf32>
    %33 = vector.multi_reduction <add>, %32, %cst_27 [1] : vector<8x8xf32> to vector<8xf32>
    %34 = vector.shape_cast %33 : vector<8xf32> to vector<8x1xf32>
    %35 = tpu.reciprocal %34 {approx = true} : vector<8x1xf32> -> vector<8x1xf32>
    %36 = vector.broadcast %35 : vector<8x1xf32> to vector<8x8xf32>
    %37 = arith.mulf %32, %36 : vector<8x8xf32>
    %cst_28 = arith.constant dense<0.000000e+00> : vector<8x16xf32>
    %38 = tpu.matmul %37, %24, %cst_28 {dimension_numbers = #tpu.dot_dimension_numbers<[1], [0], [0], [1], [0, 0, 1, 1], [], []>} : vector<8x8xf32>, vector<8x16xf32>, vector<8x16xf32> -> vector<8x16xf32>
    %c0_29 = arith.constant 0 : index
    %c0_30 = arith.constant 0 : index
    %c0_31 = arith.constant 0 : index
    %39 = vector.load %arg10[%c0_29, %c0_30, %c0_31] : memref<1x16x64xf32, #tpu.memory_space<vmem>>, vector<1x16x64xf32>
    %40 = vector.shape_cast %39 : vector<1x16x64xf32> to vector<16x64xf32>
    %cst_32 = arith.constant dense<0.000000e+00> : vector<8x64xf32>
    %41 = tpu.matmul %38, %40, %cst_32 {dimension_numbers = #tpu.dot_dimension_numbers<[1], [0], [0], [1], [0, 0, 1, 1], [], []>} : vector<8x16xf32>, vector<16x64xf32>, vector<8x64xf32> -> vector<8x64xf32>
    %c0_i32 = arith.constant 0 : i32
    %42 = arith.cmpi eq, %arg1, %c0_i32 : i32
    %43 = arith.extui %42 : i1 to i32
    %c0_i32_33 = arith.constant 0 : i32
    %44 = arith.cmpi ne, %43, %c0_i32_33 : i32
    scf.if %44 {
      %c0_40 = arith.constant 0 : index
      %c0_41 = arith.constant 0 : index
      %51 = vector.load %arg11[%c0_40, %c0_41] : memref<1x64xf32, #tpu.memory_space<vmem>>, vector<1x64xf32>
      %52 = vector.shape_cast %51 : vector<1x64xf32> to vector<1x64xf32>
      %53 = vector.broadcast %52 : vector<1x64xf32> to vector<8x64xf32>
      %c0_42 = arith.constant 0 : index
      %c0_43 = arith.constant 0 : index
      %c0_44 = arith.constant 0 : index
      %54 = vector.load %arg12[%c0_42, %c0_43, %c0_44] : memref<1x8x64xf32, #tpu.memory_space<vmem>>, vector<1x8x64xf32>
      %55 = vector.shape_cast %54 : vector<1x8x64xf32> to vector<8x64xf32>
      %56 = vector.shape_cast %53 : vector<8x64xf32> to vector<1x8x64xf32>
      tpu.vector_store %arg12[%c0_42, %c0_43, %c0_44], %56 {strides = array<i32>} : memref<1x8x64xf32, #tpu.memory_space<vmem>>, vector<1x8x64xf32>,
    } else {
    }
    %c0_34 = arith.constant 0 : index
    %c0_35 = arith.constant 0 : index
    %c0_36 = arith.constant 0 : index
    %45 = vector.load %arg12[%c0_34, %c0_35, %c0_36] : memref<1x8x64xf32, #tpu.memory_space<vmem>>, vector<1x8x64xf32>
    %46 = vector.shape_cast %45 : vector<1x8x64xf32> to vector<8x64xf32>
    %47 = arith.addf %46, %41 : vector<8x64xf32>
    %c0_37 = arith.constant 0 : index
    %c0_38 = arith.constant 0 : index
    %c0_39 = arith.constant 0 : index
    %48 = vector.load %arg12[%c0_37, %c0_38, %c0_39] : memref<1x8x64xf32, #tpu.memory_space<vmem>>, vector<1x8x64xf32>
    %49 = vector.shape_cast %48 : vector<1x8x64xf32> to vector<8x64xf32>
    %50 = vector.shape_cast %47 : vector<8x64xf32> to vector<1x8x64xf32>
    tpu.vector_store %arg12[%c0_37, %c0_38, %c0_39], %50 {strides = array<i32>} : memref<1x8x64xf32, #tpu.memory_space<vmem>>, vector<1x8x64xf32>,
    return
  }
  func.func @transform_0(%arg0: i32, %arg1: i32) -> (i32, i32, i32) {
    %c0_i32 = arith.constant 0 : i32
    %c0_i32_0 = arith.constant 0 : i32
    %c0_i32_1 = arith.constant 0 : i32
    return %arg0, %c0_i32, %c0_i32_0 : i32, i32, i32
  }
  func.func @transform_1(%arg0: i32, %arg1: i32) -> (i32, i32) {
    %c0_i32 = arith.constant 0 : i32
    %c0_i32_0 = arith.constant 0 : i32
    %c0_i32_1 = arith.constant 0 : i32
    return %c0_i32, %c0_i32_0 : i32, i32
  }
  func.func @transform_2(%arg0: i32, %arg1: i32) -> (i32, i32, i32) {
    %c0_i32 = arith.constant 0 : i32
    %c0_i32_0 = arith.constant 0 : i32
    %c0_i32_1 = arith.constant 0 : i32
    return %arg1, %c0_i32, %c0_i32_0 : i32, i32, i32
  }
  func.func @transform_3(%arg0: i32, %arg1: i32) -> (i32, i32, i32) {
    %c0_i32 = arith.constant 0 : i32
    %c0_i32_0 = arith.constant 0 : i32
    %c0_i32_1 = arith.constant 0 : i32
    return %arg1, %c0_i32, %c0_i32_0 : i32, i32, i32
  }
  func.func @transform_4(%arg0: i32, %arg1: i32) -> (i32, i32, i32) {
    %c0_i32 = arith.constant 0 : i32
    %c0_i32_0 = arith.constant 0 : i32
    %c0_i32_1 = arith.constant 0 : i32
    return %arg1, %c0_i32, %c0_i32_0 : i32, i32, i32
  }
  func.func @transform_5(%arg0: i32, %arg1: i32) -> (i32, i32, i32) {
    %c0_i32 = arith.constant 0 : i32
    %c0_i32_0 = arith.constant 0 : i32
    %c0_i32_1 = arith.constant 0 : i32
    return %arg1, %c0_i32, %c0_i32_0 : i32, i32, i32
  }
  func.func @transform_6(%arg0: i32, %arg1: i32) -> (i32, i32, i32) {
    %c0_i32 = arith.constant 0 : i32
    %c0_i32_0 = arith.constant 0 : i32
    %c0_i32_1 = arith.constant 0 : i32
    return %arg1, %c0_i32, %c0_i32_0 : i32, i32, i32
  }
  func.func @transform_7(%arg0: i32, %arg1: i32) -> (i32, i32, i32) {
    %c0_i32 = arith.constant 0 : i32
    %c0_i32_0 = arith.constant 0 : i32
    %c0_i32_1 = arith.constant 0 : i32
    return %arg1, %c0_i32, %c0_i32_0 : i32, i32, i32
  }
  func.func @transform_8(%arg0: i32, %arg1: i32) -> (i32, i32, i32) {
    %c0_i32 = arith.constant 0 : i32
    %c0_i32_0 = arith.constant 0 : i32
    %c0_i32_1 = arith.constant 0 : i32
    return %arg1, %c0_i32, %c0_i32_0 : i32, i32, i32
  }
  func.func @transform_9(%arg0: i32, %arg1: i32) -> (i32, i32) {
    %c0_i32 = arith.constant 0 : i32
    %c0_i32_0 = arith.constant 0 : i32
    %c0_i32_1 = arith.constant 0 : i32
    return %c0_i32, %c0_i32_0 : i32, i32
  }
  func.func @transform_10(%arg0: i32, %arg1: i32) -> (i32, i32, i32) {
    %c0_i32 = arith.constant 0 : i32
    %c0_i32_0 = arith.constant 0 : i32
    %c0_i32_1 = arith.constant 0 : i32
    return %arg0, %c0_i32, %c0_i32_0 : i32, i32, i32
  }
}

module attributes {stable_mosaic.version = 11 : i64} {
  func.func @conv_in_prelu_kernel(%arg0: i32, %arg1: memref<1x4x128xf32, #tpu.memory_space<vmem>>, %arg2: memref<1x8x128xf32, #tpu.memory_space<vmem>>, %arg3: memref<8x4xf32, #tpu.memory_space<vmem>>, %arg4: memref<8x1xf32, #tpu.memory_space<vmem>>, %arg5: memref<8x1xf32, #tpu.memory_space<vmem>>, %arg6: memref<8x1xf32, #tpu.memory_space<vmem>>, %arg7: memref<8x1xf32, #tpu.memory_space<vmem>>, %arg8: memref<1x8x128xf32, #tpu.memory_space<vmem>>) attributes {dimension_semantics = [#tpu.dimension_semantics<parallel>], iteration_bounds = array<i64: 2>, scalar_prefetch = 0 : i64, scratch_operands = 0 : i64, tpu.core_type = #tpu.core_type<tc>, window_params = [{transform_indices = @transform_0, window_bounds = array<i64: 1, 4, 128>}, {transform_indices = @transform_1, window_bounds = array<i64: 1, 8, 128>}, {pipeline_mode = #tpu.pipeline_mode<synchronous>, transform_indices = @transform_2, window_bounds = array<i64: 8, 4>}, {pipeline_mode = #tpu.pipeline_mode<synchronous>, transform_indices = @transform_3, window_bounds = array<i64: 8, 1>}, {pipeline_mode = #tpu.pipeline_mode<synchronous>, transform_indices = @transform_4, window_bounds = array<i64: 8, 1>}, {pipeline_mode = #tpu.pipeline_mode<synchronous>, transform_indices = @transform_5, window_bounds = array<i64: 8, 1>}, {pipeline_mode = #tpu.pipeline_mode<synchronous>, transform_indices = @transform_6, window_bounds = array<i64: 8, 1>}, {transform_indices = @transform_7, window_bounds = array<i64: 1, 8, 128>}]} {
    %c0 = arith.constant 0 : index
    %c0_0 = arith.constant 0 : index
    %c0_1 = arith.constant 0 : index
    %0 = vector.load %arg1[%c0, %c0_0, %c0_1] : memref<1x4x128xf32, #tpu.memory_space<vmem>>, vector<1x4x128xf32>
    %1 = vector.shape_cast %0 : vector<1x4x128xf32> to vector<4x128xf32>
    %c0_2 = arith.constant 0 : index
    %c0_3 = arith.constant 0 : index
    %2 = vector.load %arg3[%c0_2, %c0_3] : memref<8x4xf32, #tpu.memory_space<vmem>>, vector<8x4xf32>
    %cst = arith.constant dense<0.000000e+00> : vector<8x128xf32>
    %3 = tpu.matmul %2, %1, %cst {dimension_numbers = #tpu.dot_dimension_numbers<[1], [0], [0], [1], [0, 0, 1, 1], [], []>} : vector<8x4xf32>, vector<4x128xf32>, vector<8x128xf32> -> vector<8x128xf32>
    %c0_4 = arith.constant 0 : index
    %c0_5 = arith.constant 0 : index
    %4 = vector.load %arg4[%c0_4, %c0_5] : memref<8x1xf32, #tpu.memory_space<vmem>>, vector<8x1xf32>
    %5 = vector.broadcast %4 : vector<8x1xf32> to vector<8x128xf32>
    %6 = arith.addf %3, %5 : vector<8x128xf32>
    %cst_6 = arith.constant dense<0.000000e+00> : vector<8xf32>
    %7 = vector.multi_reduction <add>, %6, %cst_6 [1] : vector<8x128xf32> to vector<8xf32>
    %8 = vector.shape_cast %7 : vector<8xf32> to vector<8x1xf32>
    %cst_7 = arith.constant 1.280000e+02 : f32
    %9 = vector.broadcast %cst_7 : f32 to vector<8x1xf32>
    %10 = arith.divf %8, %9 : vector<8x1xf32>
    %11 = vector.broadcast %10 : vector<8x1xf32> to vector<8x128xf32>
    %12 = arith.subf %6, %11 : vector<8x128xf32>
    %13 = arith.mulf %12, %12 : vector<8x128xf32>
    %cst_8 = arith.constant dense<0.000000e+00> : vector<8xf32>
    %14 = vector.multi_reduction <add>, %13, %cst_8 [1] : vector<8x128xf32> to vector<8xf32>
    %15 = vector.shape_cast %14 : vector<8xf32> to vector<8x1xf32>
    %cst_9 = arith.constant 1.280000e+02 : f32
    %16 = vector.broadcast %cst_9 : f32 to vector<8x1xf32>
    %17 = arith.divf %15, %16 : vector<8x1xf32>
    %cst_10 = arith.constant 9.99999974E-6 : f32
    %18 = vector.broadcast %cst_10 : f32 to vector<8x1xf32>
    %19 = arith.addf %17, %18 : vector<8x1xf32>
    %20 = math.rsqrt %19 : vector<8x1xf32>
    %21 = vector.broadcast %20 : vector<8x1xf32> to vector<8x128xf32>
    %22 = arith.mulf %12, %21 : vector<8x128xf32>
    %c0_11 = arith.constant 0 : index
    %c0_12 = arith.constant 0 : index
    %23 = vector.load %arg5[%c0_11, %c0_12] : memref<8x1xf32, #tpu.memory_space<vmem>>, vector<8x1xf32>
    %24 = vector.broadcast %23 : vector<8x1xf32> to vector<8x128xf32>
    %25 = arith.mulf %22, %24 : vector<8x128xf32>
    %c0_13 = arith.constant 0 : index
    %c0_14 = arith.constant 0 : index
    %26 = vector.load %arg6[%c0_13, %c0_14] : memref<8x1xf32, #tpu.memory_space<vmem>>, vector<8x1xf32>
    %27 = vector.broadcast %26 : vector<8x1xf32> to vector<8x128xf32>
    %28 = arith.addf %25, %27 : vector<8x128xf32>
    %cst_15 = arith.constant 0.000000e+00 : f32
    %29 = vector.broadcast %cst_15 : f32 to vector<8x128xf32>
    %30 = arith.cmpf oge, %28, %29 : vector<8x128xf32>
    %c0_16 = arith.constant 0 : index
    %c0_17 = arith.constant 0 : index
    %31 = vector.load %arg7[%c0_16, %c0_17] : memref<8x1xf32, #tpu.memory_space<vmem>>, vector<8x1xf32>
    %32 = vector.broadcast %31 : vector<8x1xf32> to vector<8x128xf32>
    %33 = arith.mulf %32, %28 : vector<8x128xf32>
    %34 = arith.select %30, %28, %33 : vector<8x128xi1>, vector<8x128xf32>
    %c0_18 = arith.constant 0 : index
    %c0_19 = arith.constant 0 : index
    %c0_20 = arith.constant 0 : index
    %35 = vector.load %arg2[%c0_18, %c0_19, %c0_20] : memref<1x8x128xf32, #tpu.memory_space<vmem>>, vector<1x8x128xf32>
    %36 = vector.shape_cast %35 : vector<1x8x128xf32> to vector<8x128xf32>
    %37 = arith.addf %34, %36 : vector<8x128xf32>
    %c0_21 = arith.constant 0 : index
    %c0_22 = arith.constant 0 : index
    %c0_23 = arith.constant 0 : index
    %38 = vector.load %arg8[%c0_21, %c0_22, %c0_23] : memref<1x8x128xf32, #tpu.memory_space<vmem>>, vector<1x8x128xf32>
    %39 = vector.shape_cast %38 : vector<1x8x128xf32> to vector<8x128xf32>
    %40 = vector.shape_cast %37 : vector<8x128xf32> to vector<1x8x128xf32>
    tpu.vector_store %arg8[%c0_21, %c0_22, %c0_23], %40 {strides = array<i32>} : memref<1x8x128xf32, #tpu.memory_space<vmem>>, vector<1x8x128xf32>,
    return
  }
  func.func @transform_0(%arg0: i32) -> (i32, i32, i32) {
    %c0_i32 = arith.constant 0 : i32
    %c0_i32_0 = arith.constant 0 : i32
    %c0_i32_1 = arith.constant 0 : i32
    return %arg0, %c0_i32, %c0_i32_0 : i32, i32, i32
  }
  func.func @transform_1(%arg0: i32) -> (i32, i32, i32) {
    %c0_i32 = arith.constant 0 : i32
    %c0_i32_0 = arith.constant 0 : i32
    %c0_i32_1 = arith.constant 0 : i32
    return %arg0, %c0_i32, %c0_i32_0 : i32, i32, i32
  }
  func.func @transform_2(%arg0: i32) -> (i32, i32) {
    %c0_i32 = arith.constant 0 : i32
    %c0_i32_0 = arith.constant 0 : i32
    %c0_i32_1 = arith.constant 0 : i32
    return %c0_i32, %c0_i32_0 : i32, i32
  }
  func.func @transform_3(%arg0: i32) -> (i32, i32) {
    %c0_i32 = arith.constant 0 : i32
    %c0_i32_0 = arith.constant 0 : i32
    %c0_i32_1 = arith.constant 0 : i32
    return %c0_i32, %c0_i32_0 : i32, i32
  }
  func.func @transform_4(%arg0: i32) -> (i32, i32) {
    %c0_i32 = arith.constant 0 : i32
    %c0_i32_0 = arith.constant 0 : i32
    %c0_i32_1 = arith.constant 0 : i32
    return %c0_i32, %c0_i32_0 : i32, i32
  }
  func.func @transform_5(%arg0: i32) -> (i32, i32) {
    %c0_i32 = arith.constant 0 : i32
    %c0_i32_0 = arith.constant 0 : i32
    %c0_i32_1 = arith.constant 0 : i32
    return %c0_i32, %c0_i32_0 : i32, i32
  }
  func.func @transform_6(%arg0: i32) -> (i32, i32) {
    %c0_i32 = arith.constant 0 : i32
    %c0_i32_0 = arith.constant 0 : i32
    %c0_i32_1 = arith.constant 0 : i32
    return %c0_i32, %c0_i32_0 : i32, i32
  }
  func.func @transform_7(%arg0: i32) -> (i32, i32, i32) {
    %c0_i32 = arith.constant 0 : i32
    %c0_i32_0 = arith.constant 0 : i32
    %c0_i32_1 = arith.constant 0 : i32
    return %arg0, %c0_i32, %c0_i32_0 : i32, i32, i32
  }
}

module attributes {stable_mosaic.version = 11 : i64} {
  func.func @decoder_mask_kernel(%arg0: i32, %arg1: i32, %arg2: memref<1x8x128xf32, #tpu.memory_space<vmem>>, %arg3: memref<1x1x128xf32, #tpu.memory_space<vmem>>, %arg4: memref<8x1xf32, #tpu.memory_space<vmem>>, %arg5: memref<1x1xf32, #tpu.memory_space<vmem>>, %arg6: memref<8x1xf32, #tpu.memory_space<vmem>>, %arg7: memref<1x1xf32, #tpu.memory_space<vmem>>, %arg8: memref<1x1x128xf32, #tpu.memory_space<vmem>>, %arg9: memref<1x1x128xf32, #tpu.memory_space<vmem>>, %arg10: memref<1x1x128xf32, #tpu.memory_space<vmem>>, %arg11: memref<1x1x128xf32, #tpu.memory_space<vmem>>) attributes {dimension_semantics = [#tpu.dimension_semantics<parallel>, #tpu.dimension_semantics<parallel>], iteration_bounds = array<i64: 2, 1>, scalar_prefetch = 0 : i64, scratch_operands = 0 : i64, tpu.core_type = #tpu.core_type<tc>, window_params = [{transform_indices = @transform_0, window_bounds = array<i64: 1, 8, 128>}, {transform_indices = @transform_1, window_bounds = array<i64: 1, 1, 128>}, {pipeline_mode = #tpu.pipeline_mode<synchronous>, transform_indices = @transform_2, window_bounds = array<i64: 8, 1>}, {pipeline_mode = #tpu.pipeline_mode<synchronous>, transform_indices = @transform_3, window_bounds = array<i64: 1, 1>}, {pipeline_mode = #tpu.pipeline_mode<synchronous>, transform_indices = @transform_4, window_bounds = array<i64: 8, 1>}, {pipeline_mode = #tpu.pipeline_mode<synchronous>, transform_indices = @transform_5, window_bounds = array<i64: 1, 1>}, {transform_indices = @transform_6, window_bounds = array<i64: 1, 1, 128>}, {transform_indices = @transform_7, window_bounds = array<i64: 1, 1, 128>}, {transform_indices = @transform_8, window_bounds = array<i64: 1, 1, 128>}, {transform_indices = @transform_9, window_bounds = array<i64: 1, 1, 128>}]} {
    %c0 = arith.constant 0 : index
    %c0_0 = arith.constant 0 : index
    %c0_1 = arith.constant 0 : index
    %0 = vector.load %arg2[%c0, %c0_0, %c0_1] : memref<1x8x128xf32, #tpu.memory_space<vmem>>, vector<1x8x128xf32>
    %1 = vector.shape_cast %0 : vector<1x8x128xf32> to vector<8x128xf32>
    %c0_2 = arith.constant 0 : index
    %c0_3 = arith.constant 0 : index
    %2 = vector.load %arg4[%c0_2, %c0_3] : memref<8x1xf32, #tpu.memory_space<vmem>>, vector<8x1xf32>
    %3 = vector.broadcast %2 : vector<8x1xf32> to vector<8x128xf32>
    %4 = arith.mulf %3, %1 : vector<8x128xf32>
    %cst = arith.constant dense<0.000000e+00> : vector<128xf32>
    %5 = vector.multi_reduction <add>, %4, %cst [0] : vector<8x128xf32> to vector<128xf32>
    %6 = vector.shape_cast %5 : vector<128xf32> to vector<1x128xf32>
    %c0_4 = arith.constant 0 : index
    %c0_5 = arith.constant 0 : index
    %7 = vector.load %arg5[%c0_4, %c0_5] : memref<1x1xf32, #tpu.memory_space<vmem>>, vector<1x1xf32>
    %8 = vector.broadcast %7 : vector<1x1xf32> to vector<1x128xf32>
    %9 = arith.addf %6, %8 : vector<1x128xf32>
    %c0_6 = arith.constant 0 : index
    %c0_7 = arith.constant 0 : index
    %10 = vector.load %arg6[%c0_6, %c0_7] : memref<8x1xf32, #tpu.memory_space<vmem>>, vector<8x1xf32>
    %11 = vector.broadcast %10 : vector<8x1xf32> to vector<8x128xf32>
    %12 = arith.mulf %11, %1 : vector<8x128xf32>
    %cst_8 = arith.constant dense<0.000000e+00> : vector<128xf32>
    %13 = vector.multi_reduction <add>, %12, %cst_8 [0] : vector<8x128xf32> to vector<128xf32>
    %14 = vector.shape_cast %13 : vector<128xf32> to vector<1x128xf32>
    %c0_9 = arith.constant 0 : index
    %c0_10 = arith.constant 0 : index
    %15 = vector.load %arg7[%c0_9, %c0_10] : memref<1x1xf32, #tpu.memory_space<vmem>>, vector<1x1xf32>
    %16 = vector.broadcast %15 : vector<1x1xf32> to vector<1x128xf32>
    %17 = arith.addf %14, %16 : vector<1x128xf32>
    %c0_11 = arith.constant 0 : index
    %c0_12 = arith.constant 0 : index
    %c0_13 = arith.constant 0 : index
    %18 = vector.load %arg3[%c0_11, %c0_12, %c0_13] : memref<1x1x128xf32, #tpu.memory_space<vmem>>, vector<1x1x128xf32>
    %19 = vector.shape_cast %18 : vector<1x1x128xf32> to vector<1x128xf32>
    %20 = arith.mulf %9, %19 : vector<1x128xf32>
    %c0_14 = arith.constant 0 : index
    %c0_15 = arith.constant 0 : index
    %c0_16 = arith.constant 0 : index
    %21 = vector.load %arg8[%c0_14, %c0_15, %c0_16] : memref<1x1x128xf32, #tpu.memory_space<vmem>>, vector<1x1x128xf32>
    %22 = vector.shape_cast %21 : vector<1x1x128xf32> to vector<1x128xf32>
    %23 = vector.shape_cast %20 : vector<1x128xf32> to vector<1x1x128xf32>
    tpu.vector_store %arg8[%c0_14, %c0_15, %c0_16], %23 {strides = array<i32>} : memref<1x1x128xf32, #tpu.memory_space<vmem>>, vector<1x1x128xf32>,
    %c0_17 = arith.constant 0 : index
    %c0_18 = arith.constant 0 : index
    %c0_19 = arith.constant 0 : index
    %24 = vector.load %arg9[%c0_17, %c0_18, %c0_19] : memref<1x1x128xf32, #tpu.memory_space<vmem>>, vector<1x1x128xf32>
    %25 = vector.shape_cast %24 : vector<1x1x128xf32> to vector<1x128xf32>
    %26 = vector.shape_cast %17 : vector<1x128xf32> to vector<1x1x128xf32>
    tpu.vector_store %arg9[%c0_17, %c0_18, %c0_19], %26 {strides = array<i32>} : memref<1x1x128xf32, #tpu.memory_space<vmem>>, vector<1x1x128xf32>,
    %27 = math.cos %17 : vector<1x128xf32>
    %28 = arith.mulf %20, %27 : vector<1x128xf32>
    %c0_20 = arith.constant 0 : index
    %c0_21 = arith.constant 0 : index
    %c0_22 = arith.constant 0 : index
    %29 = vector.load %arg10[%c0_20, %c0_21, %c0_22] : memref<1x1x128xf32, #tpu.memory_space<vmem>>, vector<1x1x128xf32>
    %30 = vector.shape_cast %29 : vector<1x1x128xf32> to vector<1x128xf32>
    %31 = vector.shape_cast %28 : vector<1x128xf32> to vector<1x1x128xf32>
    tpu.vector_store %arg10[%c0_20, %c0_21, %c0_22], %31 {strides = array<i32>} : memref<1x1x128xf32, #tpu.memory_space<vmem>>, vector<1x1x128xf32>,
    %32 = math.sin %17 : vector<1x128xf32>
    %33 = arith.mulf %20, %32 : vector<1x128xf32>
    %c0_23 = arith.constant 0 : index
    %c0_24 = arith.constant 0 : index
    %c0_25 = arith.constant 0 : index
    %34 = vector.load %arg11[%c0_23, %c0_24, %c0_25] : memref<1x1x128xf32, #tpu.memory_space<vmem>>, vector<1x1x128xf32>
    %35 = vector.shape_cast %34 : vector<1x1x128xf32> to vector<1x128xf32>
    %36 = vector.shape_cast %33 : vector<1x128xf32> to vector<1x1x128xf32>
    tpu.vector_store %arg11[%c0_23, %c0_24, %c0_25], %36 {strides = array<i32>} : memref<1x1x128xf32, #tpu.memory_space<vmem>>, vector<1x1x128xf32>,
    return
  }
  func.func @transform_0(%arg0: i32, %arg1: i32) -> (i32, i32, i32) {
    %c0_i32 = arith.constant 0 : i32
    %c0_i32_0 = arith.constant 0 : i32
    return %arg0, %c0_i32, %arg1 : i32, i32, i32
  }
  func.func @transform_1(%arg0: i32, %arg1: i32) -> (i32, i32, i32) {
    %c0_i32 = arith.constant 0 : i32
    %c0_i32_0 = arith.constant 0 : i32
    return %arg0, %c0_i32, %arg1 : i32, i32, i32
  }
  func.func @transform_2(%arg0: i32, %arg1: i32) -> (i32, i32) {
    %c0_i32 = arith.constant 0 : i32
    %c0_i32_0 = arith.constant 0 : i32
    %c0_i32_1 = arith.constant 0 : i32
    return %c0_i32, %c0_i32_0 : i32, i32
  }
  func.func @transform_3(%arg0: i32, %arg1: i32) -> (i32, i32) {
    %c0_i32 = arith.constant 0 : i32
    %c0_i32_0 = arith.constant 0 : i32
    %c0_i32_1 = arith.constant 0 : i32
    return %c0_i32, %c0_i32_0 : i32, i32
  }
  func.func @transform_4(%arg0: i32, %arg1: i32) -> (i32, i32) {
    %c0_i32 = arith.constant 0 : i32
    %c0_i32_0 = arith.constant 0 : i32
    %c0_i32_1 = arith.constant 0 : i32
    return %c0_i32, %c0_i32_0 : i32, i32
  }
  func.func @transform_5(%arg0: i32, %arg1: i32) -> (i32, i32) {
    %c0_i32 = arith.constant 0 : i32
    %c0_i32_0 = arith.constant 0 : i32
    %c0_i32_1 = arith.constant 0 : i32
    return %c0_i32, %c0_i32_0 : i32, i32
  }
  func.func @transform_6(%arg0: i32, %arg1: i32) -> (i32, i32, i32) {
    %c0_i32 = arith.constant 0 : i32
    %c0_i32_0 = arith.constant 0 : i32
    return %arg0, %c0_i32, %arg1 : i32, i32, i32
  }
  func.func @transform_7(%arg0: i32, %arg1: i32) -> (i32, i32, i32) {
    %c0_i32 = arith.constant 0 : i32
    %c0_i32_0 = arith.constant 0 : i32
    return %arg0, %c0_i32, %arg1 : i32, i32, i32
  }
  func.func @transform_8(%arg0: i32, %arg1: i32) -> (i32, i32, i32) {
    %c0_i32 = arith.constant 0 : i32
    %c0_i32_0 = arith.constant 0 : i32
    return %arg0, %c0_i32, %arg1 : i32, i32, i32
  }
  func.func @transform_9(%arg0: i32, %arg1: i32) -> (i32, i32, i32) {
    %c0_i32 = arith.constant 0 : i32
    %c0_i32_0 = arith.constant 0 : i32
    return %arg0, %c0_i32, %arg1 : i32, i32, i32
  }
}

</mosaic_0001>

<bundles_post_ra>
// kernel: semamba_code2dreat_forward.6
= control target key start
LH: loop header
LB: loop body
LE: loop exit
PB: predicated region body
PF: predicated region fallthrough
CT: control target
= control target key end

     0   :  { %s499_s21 = smov 0   ;;  %s535_s0 = inlined_call_operand.vmem [shape: f32[2,8,128], index: 0, kind: input, shape index: {}]   ;;  %s536_s1 = inlined_call_operand.vmem [shape: f32[4,8], index: 1, kind: input, shape index: {}]   ;;  %s537_s2 = inlined_call_operand.vmem [shape: f32[4,1], index: 2, kind: input, shape index: {}]   ;;  %s538_s3 = inlined_call_operand.vmem [shape: f32[4,1], index: 3, kind: input, shape index: {}]   ;;  %s539_s4 = inlined_call_operand.vmem [shape: f32[4,1], index: 4, kind: input, shape index: {}]   ;;  %s540_s5 = inlined_call_operand.vmem [shape: f32[4,1], index: 5, kind: input, shape index: {}]   ;;  %s541_s6 = inlined_call_operand.vmem [shape: f32[2,4,128], index: 6, kind: output, shape index: {}]  }
   0x1 LB: > { %s421_s22 = sadd.s32 4294967295, %s459_s21   ;;  %p425_p0 = scmp.ge.s32.totalorder %s459_s21, 1  ;;  %s459_s21 = sphi %s499_s21, %s16_s21  }
   0x2   : > { %p211_p1 = scmp.lt.s32.totalorder %s459_s21, 3 }
   0x4   : > { %p212_p2 = pnand %p425_p0, %p211_p1 }
   0x5   : > { %p239_p3 = scmp.lt.s32.totalorder (!%p212_p2), %s421_s22, 1 }
   0x6   : > { %215 = sbr.rel (%p212_p2) target bundleno = 523 (0x20b), region = 44 }
   0xb   : > { %v461_v0 = vmov 0.0   ;;  %vm462_vm0 = vmmov 0   ;;  %v249_v1 = vld [vmem:[%s537_s2] sm:$0xf]  ;;  %s543_s22 = smov (!%p239_p3, %s421_s22), 1  ;;  %v463_v2 = vmov 0  }
   0xc   : > { %433 = vmatprep.subr.mxu0 %v461_v0  ;;  %435 = vmatprep.mubr.msk.f32.mxu0 %vm462_vm0, %v461_v0  ;;  %s426_s25 = sshll.u32 %s543_s22, 3  ;;  %v248_v3 = vld [vmem:[%s536_s1] sm:$0xf]  ;;  %vm255_vm1 = vcmask 64512   ;;  %vm329_vm2 = vcmask 1043456   ;;  %s427_s13 = sshll.u32 %s543_s22, 2 }
   0xd   : > { %449 = vset.pattern.permute.xlu0 %v463_v2  ;;  %450 = vset.pattern.permute.xlu1 %v463_v2  ;;  %s242_s28 = scalar_lea.vmem %s535_s0, %s426_s25  ;;  %v344_v5 = vld [vmem:[%s538_s3] sm:$0xf]  ;;  %s246_s16 = scalar_lea.vmem %s541_s6, %s427_s13 }
   0xe   : > { %252 = vperm.xlu0 %449, %v249_v1   ;;  %v247_v4 = vld [vmem:[%s242_s28] sm:$0xff]  ;;  %347 = vperm.xlu1 %450, %v344_v5  }
   0xf   : > { %434 = vmatpush3.msra.mxu0 %v247_v4  ;;  %v351_v6 = vld [vmem:[%s539_s4] sm:$0xf] }
  0x10   : > { %436 = vmatmul.mubr.msk.f32.vlgmr.msra.gmra.mxu0 %vm255_vm1, %v248_v3  ;;  %v359_v17 = vld [vmem:[%s540_s5] sm:$0xf] }
  0x12   : > { %354 = vperm.xlu1 %450, %v351_v6  }
  0x89   : > { %v253_v7 = vpop.permute.xlu0 %252  ;;  %v348_v18 = vpop.permute.xlu1 %347 }
  0x8d   : > { %v355_v19 = vpop.permute.xlu1 %354 }
  0xd0   : > { %v325_v8 = vpop.f32.mrf.mxu0 }
  0xd1   : > { %v326_v9 = vadd.f32 %v325_v8, %v253_v7 }
  0xd2   : > { %v437_v10 = vpop.f32.mrf.mxu0 }
  0xd3   : > { %v330_v11 = vsel %vm329_vm2, %v326_v9, 0.0 }
  0xd4   : > { %331 = vadd.xlane.f32.xlu0 %v330_v11 }
 0x15d   : > { %v332_v12 = vpop.xlane.xlu0 %331 }
 0x15e   : > { %v334_v13 = vmul.f32 0.0078125, %v332_v12 }
 0x160   : > { %v335_v14 = vsub.f32 %v326_v9, %v334_v13 }
 0x162   : > { %v336_v15 = vmul.f32 %v335_v14, %v335_v14 }
 0x164   : > { %v337_v16 = vsel %vm329_vm2, %v336_v15, 0.0 }
 0x165   : > { %338 = vadd.xlane.f32.xlu1 %v337_v16 }
 0x176   : > { %362 = vperm.xlu1 %450, %v359_v17  }
 0x1ee   : > { %v339_v20 = vpop.xlane.xlu1 %338 }
 0x1ef   : > { %v340_v21 = vmul.f32 0.0078125, %v339_v20 }
 0x1f1   : > { %v341_v22 = vadd.f32 1e-05, %v340_v21 }
 0x1f2   : > { %v363_v27 = vpop.permute.xlu1 %362 }
 0x1f3   : > { %451 = vrsqrt.f32 %v341_v22 }
 0x200   : > { %v452_v23 = vpop.eup %451 }
 0x201   : > { %v343_v24 = vmul.f32 %v452_v23, %v335_v14 }
 0x203   : > { %v350_v25 = vmul.f32 %v348_v18, %v343_v24 }
 0x205   : > { %v357_v26 = vadd.f32 %v355_v19, %v350_v25 }
 0x207   : > { %vm358_vm3 = vcmp.ge.f32.partialorder %v357_v26, 0.0  ;;  %v365_v28 = vmul.f32 %v363_v27, %v357_v26 }
 0x209   : > { %v366_v29 = vsel %vm358_vm3, %v357_v26, %v365_v28 }
 0x20a   : > { %367 = vst [vmem:[%s246_s16] sm:$0xf] %v366_v29 }
 0x20b PF: > { %s16_s21 = sadd.s32 1, %s459_s21  }
 0x20c   : > { %p13_p4 = scmp.ge.s32.totalorder %s16_s21, 4  }
 0x20e   :  { %15 = sbr.rel (!%p13_p4) target bundleno = 1 (0x1), region = 74 }

// kernel: semamba_code2dreat_forward.5
= control target key start
LH: loop header
LB: loop body
LE: loop exit
PB: predicated region body
PF: predicated region fallthrough
CT: control target
= control target key end

     0   :  { %s501_s21 = smov 0   ;;  %s537_s0 = inlined_call_operand.vmem [shape: f32[2,2,128], index: 0, kind: input, shape index: {}]   ;;  %s538_s1 = inlined_call_operand.vmem [shape: f32[8,2], index: 1, kind: input, shape index: {}]   ;;  %s539_s2 = inlined_call_operand.vmem [shape: f32[8,1], index: 2, kind: input, shape index: {}]   ;;  %s540_s3 = inlined_call_operand.vmem [shape: f32[8,1], index: 3, kind: input, shape index: {}]   ;;  %s541_s4 = inlined_call_operand.vmem [shape: f32[8,1], index: 4, kind: input, shape index: {}]   ;;  %s542_s5 = inlined_call_operand.vmem [shape: f32[8,1], index: 5, kind: input, shape index: {}]   ;;  %s543_s6 = inlined_call_operand.vmem [shape: f32[2,8,128], index: 6, kind: output, shape index: {}]  }
   0x1 LB: > { %s422_s22 = sadd.s32 4294967295, %s461_s21   ;;  %p426_p0 = scmp.ge.s32.totalorder %s461_s21, 1  ;;  %s461_s21 = sphi %s501_s21, %s16_s21  }
   0x2   : > { %p211_p1 = scmp.lt.s32.totalorder %s461_s21, 3 }
   0x4   : > { %p212_p2 = pnand %p426_p0, %p211_p1 }
   0x5   : > { %p239_p3 = scmp.lt.s32.totalorder (!%p212_p2), %s422_s22, 1 }
   0x6   : > { %215 = sbr.rel (%p212_p2) target bundleno = 521 (0x209), region = 44 }
   0xb   : > { %v463_v0 = vmov 0.0   ;;  %vm464_vm0 = vmmov 0   ;;  %v249_v1 = vld [vmem:[%s539_s2] sm:$0xff]  ;;  %s545_s22 = smov (!%p239_p3, %s422_s22), 1  ;;  %v465_v2 = vmov 0   ;;  %vm259_vm1 = vcmask 1041408  }
   0xc   : > { %435 = vmatprep.subr.mxu0 %v463_v0  ;;  %437 = vmatprep.mubr.msk.f32.mxu0 %vm464_vm0, %v463_v0  ;;  %s427_s25 = sshll.u32 %s545_s22, 1  ;;  %v248_v3 = vld [vmem:[%s538_s1] sm:$0xff]  ;;  %vm255_vm2 = vcmask 15360   ;;  %s428_s13 = sshll.u32 %s545_s22, 3 }
   0xd   : > { %451 = vset.pattern.permute.xlu0 %v465_v2  ;;  %452 = vset.pattern.permute.xlu1 %v465_v2  ;;  %s242_s28 = scalar_lea.vmem %s537_s0, %s427_s25  ;;  %v345_v5 = vld [vmem:[%s540_s3] sm:$0xff]  ;;  %s246_s16 = scalar_lea.vmem %s543_s6, %s428_s13 }
   0xe   : > { %252 = vperm.xlu0 %451, %v249_v1   ;;  %v247_v4 = vld [vmem:[%s242_s28] sm:$0x3]  ;;  %348 = vperm.xlu1 %452, %v345_v5  }
   0xf   : > { %436 = vmatpush3.msk.msra.mxu0 %vm259_vm1, %v247_v4  ;;  %v352_v6 = vld [vmem:[%s541_s4] sm:$0xff] }
  0x10   : > { %438 = vmatmul.mubr.msk.f32.vlgmr.msra.gmra.mxu0 %vm255_vm2, %v248_v3  ;;  %v360_v15 = vld [vmem:[%s542_s5] sm:$0xff] }
  0x12   : > { %355 = vperm.xlu1 %452, %v352_v6  }
  0x89   : > { %v253_v7 = vpop.permute.xlu0 %252  ;;  %v349_v16 = vpop.permute.xlu1 %348 }
  0x8d   : > { %v356_v17 = vpop.permute.xlu1 %355 }
  0xd0   : > { %v329_v8 = vpop.f32.mrf.mxu0 }
  0xd1   : > { %v330_v9 = vadd.f32 %v329_v8, %v253_v7 }
  0xd2   : > { %v439_v10 = vpop.f32.mrf.mxu0 }
  0xd3   : > { %333 = vadd.xlane.f32.xlu0 %v330_v9 }
 0x15c   : > { %v334_v11 = vpop.xlane.xlu0 %333 }
 0x15d   : > { %v336_v12 = vmul.f32 0.0078125, %v334_v11 }
 0x15f   : > { %v337_v13 = vsub.f32 %v330_v9, %v336_v12 }
 0x161   : > { %v338_v14 = vmul.f32 %v337_v13, %v337_v13 }
 0x163   : > { %339 = vadd.xlane.f32.xlu1 %v338_v14 }
 0x174   : > { %363 = vperm.xlu1 %452, %v360_v15  }
 0x1ec   : > { %v340_v18 = vpop.xlane.xlu1 %339 }
 0x1ed   : > { %v341_v19 = vmul.f32 0.0078125, %v340_v18 }
 0x1ef   : > { %v342_v20 = vadd.f32 1e-05, %v341_v19 }
 0x1f0   : > { %v364_v25 = vpop.permute.xlu1 %363 }
 0x1f1   : > { %453 = vrsqrt.f32 %v342_v20 }
 0x1fe   : > { %v454_v21 = vpop.eup %453 }
 0x1ff   : > { %v344_v22 = vmul.f32 %v454_v21, %v337_v13 }
 0x201   : > { %v351_v23 = vmul.f32 %v349_v16, %v344_v22 }
 0x203   : > { %v358_v24 = vadd.f32 %v356_v17, %v351_v23 }
 0x205   : > { %vm359_vm3 = vcmp.ge.f32.partialorder %v358_v24, 0.0  ;;  %v366_v26 = vmul.f32 %v364_v25, %v358_v24 }
 0x207   : > { %v367_v27 = vsel %vm359_vm3, %v358_v24, %v366_v26 }
 0x208   : > { %368 = vst [vmem:[%s246_s16] sm:$0xff] %v367_v27 }
 0x209 PF: > { %s16_s21 = sadd.s32 1, %s461_s21  }
 0x20a   : > { %p13_p4 = scmp.ge.s32.totalorder %s16_s21, 4  }
 0x20c   :  { %15 = sbr.rel (!%p13_p4) target bundleno = 1 (0x1), region = 74 }

// kernel: semamba_code2dreat_forward.7
= control target key start
LH: loop header
LB: loop body
LE: loop exit
PB: predicated region body
PF: predicated region fallthrough
CT: control target
= control target key end

     0   :  { %s1427_s13 = smov 0   ;;  %s1429_s14 = smov 0   ;;  %s1601_s0 = inlined_call_operand.vmem [shape: f32[2,8,64], index: 0, kind: input, shape index: {}]   ;;  %s1602_s1 = inlined_call_operand.vmem [shape: f32[8,64], index: 1, kind: input, shape index: {}]   ;;  %s1603_s2 = inlined_call_operand.vmem [shape: f32[4,64,16], index: 2, kind: input, shape index: {}]   ;;  %s1604_s3 = inlined_call_operand.vmem [shape: f32[4,64,16], index: 3, kind: input, shape index: {}]   ;;  %s1605_s4 = inlined_call_operand.vmem [shape: f32[4,64,16], index: 4, kind: input, shape index: {}]   ;;  %s1606_s5 = inlined_call_operand.vmem [shape: f32[4,1,16], index: 5, kind: input, shape index: {}]   ;;  %s1607_s6 = inlined_call_operand.vmem [shape: f32[4,1,16], index: 6, kind: input, shape index: {}]   ;;  %s1608_s7 = inlined_call_operand.vmem [shape: f32[4,1,16], index: 7, kind: input, shape index: {}]   ;;  %s1609_s8 = inlined_call_operand.vmem [shape: f32[4,16,64], index: 8, kind: input, shape index: {}]   ;;  %s1610_s9 = inlined_call_operand.vmem [shape: f32[1,64], index: 9, kind: input, shape index: {}]   ;;  %s1611_s10 = inlined_call_operand.vmem [shape: f32[2,8,64], index: 10, kind: output, shape index: {}]  }
   0x1   :  { %s1431_s15 = smov 0   ;;  %s1433_s16 = smov 0  }
   0x2   :  { %s1435_s17 = smov 0  }
   0x3 LB: > { %s29_s18 = sadd.s32 1, %s1360_s15  ;;  %s32_s19 = sadd.s32 1, %s1364_s16  ;;  %s1368_s17 = sphi %s1435_s17, %s20_s17   ;;  %s1364_s16 = sphi %s1433_s16, %s1615_s16   ;;  %s1360_s15 = sphi %s1431_s15, %s1614_s15   ;;  %s1356_s14 = sphi %s1429_s14, %s1613_s14   ;;  %s1352_s13 = sphi %s1427_s13, %s1612_s13  }
   0x4   : > { %p30_p0 = scmp.ge.s32.totalorder %s29_s18, 4  ;;  %p1147_p1 = scmp.ge.s32.totalorder %s1368_s17, 1 }
   0x5   : > { %p387_p2 = scmp.lt.s32.totalorder %s1368_s17, 9 }
   0x6   : > { %s1617_s18 = smov (%p30_p0, %s29_s18), 0  ;;  %s1619_s19 = smov (!%p30_p0, %s32_s19), %s1364_s16 }
   0x7   : > { %p388_p3 = pnand %p1147_p1, %p387_p2  ;;  %p34_p4 = scmp.ge.s32.totalorder %s1619_s19, 2 }
   0x8   : > { %p456_p5 = scmp.lt.s32.totalorder (!%p388_p3), %s1352_s13, 3  ;;  %p452_p6 = scmp.lt.s32.totalorder (!%p388_p3), %s1356_s14, 1 }
   0x9   : > { %s1621_s19 = smov (%p34_p4, %s1619_s19), 0  ;;  %391 = sbr.rel (%p388_p3) target bundleno = 1138 (0x472), region = 60 }
   0xa   : > { %p1168_p7 = scmp.ne.s32.totalorder (!%p388_p3), %s1352_s13, 0 }
   0xe   : > { %v1370_v0 = vmov 0.0   ;;  %s1463_s20 = scalar_select %p456_p5, %s1352_s13, 3  ;;  %vm1371_vm0 = vmmov 0   ;;  %v490_v14 = vld [vmem:[%s1602_s1] sm:$0xff]  ;;  %vm507_vm1 = vcmask 523264   ;;  %vm752_vm2 = vcmask 130048  }
   0xf   : > { %1210 = vmatprep.subr.mxu0 %v1370_v0  ;;  %1229 = vmatprep.subr.mxu1 %v1370_v0  ;;  %s1623_s14 = smov (!%p452_p6, %s1356_s14), 1  ;;  %vm829_vm3 = vcmask 64512  }
  0x10   : > { %1226 = vmatprep.mubr.msk.f32.mxu0 %vm1371_vm0, %v1370_v0  ;;  %1245 = vmatprep.mubr.msk.f32.mxu1 %vm1371_vm0, %v1370_v0  ;;  %s1472_s21 = sshll.u32 %s1463_s20, 6  ;;  %s1148_s28 = sshll.u32 %s1623_s14, 3 }
  0x11   : > { %s1478_s24 = scalar_lea.vmem %s1603_s2, %s1472_s21  ;;  %s1484_s27 = scalar_lea.vmem %s1604_s3, %s1472_s21 }
  0x12   : > { %v499_v1 = vld [vmem:[%s1478_s24 + $0x38] sm:$0xff]  ;;  %v498_v3 = vld [vmem:[%s1478_s24 + $0x30] sm:$0xff]  ;;  %s1494_s11 = scalar_lea.vmem %s1611_s10, %s1148_s28  ;;  %v497_v5 = vld [vmem:[%s1478_s24 + $0x28] sm:$0xff]  ;;  %s455_s22 = scalar_lea.vmem %s1601_s0, %s1148_s28 }
  0x13   : > { %v588_v2 = vld [vmem:[%s1484_s27 + $0x38] sm:$0xff]  ;;  %1211 = vmatpush3.msra.mxu0 %v499_v1  ;;  %v587_v4 = vld [vmem:[%s1484_s27 + $0x30] sm:$0xff]  ;;  %v586_v6 = vld [vmem:[%s1484_s27 + $0x28] sm:$0xff]  ;;  %s476_s30 = scalar_lea.vmem %s1607_s6, %s1463_s20  ;;  %s479_s25 = scalar_lea.vmem %s1608_s7, %s1463_s20 }
  0x14   : > { %1230 = vmatpush3.msra.mxu1 %v588_v2  ;;  %1212 = vmatprep.subr.mxu0 %v1370_v0  ;;  %v496_v7 = vld [vmem:[%s1478_s24 + $0x20] sm:$0xff]  ;;  %v495_v9 = vld [vmem:[%s1478_s24 + $0x18] sm:$0xff]  ;;  %v494_v11 = vld [vmem:[%s1478_s24 + $0x10] sm:$0xff] }
  0x15   : > { %1231 = vmatprep.subr.mxu1 %v1370_v0  ;;  %1213 = vmatpush3.msra.mxu0 %v498_v3  ;;  %v585_v8 = vld [vmem:[%s1484_s27 + $0x20] sm:$0xff]  ;;  %v584_v10 = vld [vmem:[%s1484_s27 + $0x18] sm:$0xff]  ;;  %v583_v12 = vld [vmem:[%s1484_s27 + $0x10] sm:$0xff] }
  0x16   : > { %1232 = vmatpush3.msra.mxu1 %v587_v4  ;;  %1214 = vmatprep.subr.mxu0 %v1370_v0  ;;  %v489_v13 = vld [vmem:[%s455_s22] sm:$0xff]  ;;  %v493_v15 = vld [vmem:[%s1478_s24 + $0x8] sm:$0xff]  ;;  %s470_s22 = scalar_lea.vmem %s1605_s4, %s1472_s21 }
  0x17   : > { %1233 = vmatprep.subr.mxu1 %v1370_v0  ;;  %1215 = vmatpush3.msra.mxu0 %v497_v5  ;;  %v582_v16 = vld [vmem:[%s1484_s27 + $0x8] sm:$0xff]  ;;  %v492_v17 = vld [vmem:[%s1478_s24] sm:$0xff]  ;;  %v491_v19 = vadd.f32 %v490_v14, %v489_v13  ;;  %v673_v29 = vld [vmem:[%s470_s22 + $0x38] sm:$0xff]  ;;  %s1175_s24 = sshll.u32 %s1463_s20, 4 }
  0x18   : > { %1234 = vmatpush3.msra.mxu1 %v586_v6  ;;  %1216 = vmatprep.subr.mxu0 %v1370_v0  ;;  %v581_v18 = vld [vmem:[%s1484_s27] sm:$0xff]  ;;  %s473_s27 = scalar_lea.vmem %s1606_s5, %s1463_s20  ;;  %v672_v30 = vld [vmem:[%s470_s22 + $0x30] sm:$0xff]  ;;  %v671_v31 = vld [vmem:[%s470_s22 + $0x28] sm:$0xff]  ;;  %s484_s28 = scalar_lea.vmem %s1609_s8, %s1175_s24 }
  0x19   : > { %1235 = vmatprep.subr.mxu1 %v1370_v0  ;;  %1217 = vmatpush3.msra.mxu0 %v496_v7  ;;  %v1158_v20 = vld [vmem:[%s473_s27] ss:$0 sm:$0xff]  ;;  %v669_v33 = vld [vmem:[%s470_s22 + $0x18] sm:$0xff]  ;;  %v668_v34 = vld [vmem:[%s470_s22 + $0x10] sm:$0xff] }
  0x1a   : > { %1236 = vmatpush3.msra.mxu1 %v585_v8  ;;  %1218 = vmatprep.subr.mxu0 %v1370_v0  ;;  %v1160_v21 = vld [vmem:[%s476_s30] ss:$0 sm:$0xff]  ;;  %v667_v35 = vld [vmem:[%s470_s22 + $0x8] sm:$0xff] }
  0x1b   : > { %1237 = vmatprep.subr.mxu1 %v1370_v0  ;;  %1219 = vmatpush3.msra.mxu0 %v495_v9  ;;  %v670_v32 = vld [vmem:[%s470_s22 + $0x20] sm:$0xff]  ;;  %v915_v52 = vld [vmem:[%s484_s28 + $0x8] sm:$0xff] }
  0x1c   : > { %1238 = vmatpush3.msra.mxu1 %v584_v10  ;;  %1220 = vmatprep.subr.mxu0 %v1370_v0  ;;  %v666_v36 = vld [vmem:[%s470_s22] sm:$0xff] }
  0x1d   : > { %1239 = vmatprep.subr.mxu1 %v1370_v0  ;;  %1221 = vmatpush3.msra.mxu0 %v494_v11  ;;  %v1162_v46 = vld [vmem:[%s479_s25] ss:$0 sm:$0xff] }
  0x1e   : > { %1240 = vmatpush3.msra.mxu1 %v583_v12  ;;  %1222 = vmatprep.subr.mxu0 %v1370_v0  ;;  %v914_v53 = vld [vmem:[%s484_s28] sm:$0xff] }
  0x1f   : > { %1241 = vmatprep.subr.mxu1 %v1370_v0  ;;  %1223 = vmatpush3.msra.mxu0 %v493_v15 }
  0x20   : > { %1242 = vmatpush3.msra.mxu1 %v582_v16  ;;  %1224 = vmatprep.subr.mxu0 %v1370_v0 }
  0x21   : > { %1243 = vmatprep.subr.mxu1 %v1370_v0  ;;  %1225 = vmatpush3.msra.mxu0 %v492_v17 }
  0x22   : > { %1244 = vmatpush3.msra.mxu1 %v581_v18  ;;  %1227 = vmatmul.mubr.msk.f32.vlgmr.msra.gmra.mxu0 %vm507_vm1, %v491_v19 }
  0x23   : > { %1246 = vmatmul.mubr.msk.f32.vlgmr.msra.gmra.mxu1 %vm507_vm1, %v491_v19  ;;  %1267 = vmatprep.subr.mxu1 %v1370_v0 }
  0x24   : > { %1269 = vmatprep.mubr.msk.f32.mxu1 %vm1371_vm0, %v1370_v0  ;;  %1248 = vmatprep.subr.mxu0 %v1370_v0 }
  0x25   : > { %1264 = vmatprep.mubr.msk.f32.mxu0 %vm1371_vm0, %v1370_v0  ;;  %1249 = vmatpush3.msra.mxu0 %v673_v29 }
  0x26   : > { %1250 = vmatprep.subr.mxu0 %v1370_v0 }
  0x27   : > { %1251 = vmatpush3.msra.mxu0 %v672_v30 }
  0x28   : > { %1252 = vmatprep.subr.mxu0 %v1370_v0 }
  0x29   : > { %1253 = vmatpush3.msra.mxu0 %v671_v31 }
  0x2a   : > { %1254 = vmatprep.subr.mxu0 %v1370_v0 }
  0x2b   : > { %1255 = vmatpush3.msra.mxu0 %v670_v32 }
  0x2c   : > { %1256 = vmatprep.subr.mxu0 %v1370_v0 }
  0x2d   : > { %1257 = vmatpush3.msra.mxu0 %v669_v33 }
  0x2e   : > { %1258 = vmatprep.subr.mxu0 %v1370_v0 }
  0x2f   : > { %1259 = vmatpush3.msra.mxu0 %v668_v34 }
  0x30   : > { %1260 = vmatprep.subr.mxu0 %v1370_v0 }
  0x31   : > { %1261 = vmatpush3.msra.mxu0 %v667_v35 }
  0x32   : > { %1262 = vmatprep.subr.mxu0 %v1370_v0 }
  0x33   : > { %1263 = vmatpush3.msra.mxu0 %v666_v36 }
  0x34   : > { %1265 = vmatmul.mubr.msk.f32.vlgmr.msra.gmra.mxu0 %vm507_vm1, %v491_v19 }
  0xe2   : > { %v577_v22 = vpop.f32.mrf.mxu0 }
  0xe3   : > { %v662_v23 = vpop.f32.mrf.mxu1  ;;  %v578_v24 = vadd.f32 %v1158_v20, %v577_v22 }
  0xe4   : > { %v663_v25 = vadd.f32 %v1160_v21, %v662_v23  ;;  %v1228_v26 = vpop.f32.mrf.mxu0 }
  0xe5   : > { %v1247_v27 = vpop.f32.mrf.mxu1  ;;  %v751_v28 = vmul.f32 0.25, %v578_v24 }
  0xe6   : > { %1268 = vmatpush3.xpose.msk.msra.mxu1 %vm752_vm2, %v663_v25 }
  0xe7   : > { %1272 = vmatprep.subr.mxu1 %v1370_v0 }
  0xe9   : > { %1270 = vmatmul.mubr.msk.f32.vlgmr.msra.gmra.mxu1 %vm752_vm2, %v751_v28 }
  0xea   : > { %1274 = vmatprep.mubr.msk.f32.mxu1 %vm1371_vm0, %v1370_v0 }
  0xf4   : > { %v747_v45 = vpop.f32.mrf.mxu0 }
  0xf5   : > { %v748_v47 = vadd.f32 %v1162_v46, %v747_v45 }
  0xf6   : > { %v1266_v48 = vpop.f32.mrf.mxu0 }
  0xf7   : > { %1273 = vmatpush3.msra.mxu1 %v748_v47 }
  0xf8   : > { %1277 = vmatprep.subr.mxu1 %v1370_v0 }
 0x1a9   : > { %v825_v37 = vpop.f32.mrf.mxu1 }
 0x1aa   : > { %v830_v38 = vsel %vm829_vm3, %v825_v37, -inf }
 0x1ab   : > { %831 = vmax.xlane.f32.xlu0 %v830_v38  ;;  %v1271_v39 = vpop.f32.mrf.mxu1 }
 0x234   : > { %v832_v40 = vpop.xlane.xlu0 %831 }
 0x235   : > { %v833_v41 = vsub.f32 %v825_v37, %v832_v40 }
 0x237   : > { %v834_v42 = vmul.f32 1.442695, %v833_v41 }
 0x239   : > { %1326 = vpow2.f32 %v834_v42 }
 0x246   : > { %v1327_v43 = vpop.eup %1326 }
 0x247   : > { %v836_v44 = vsel %vm829_vm3, %v1327_v43, 0.0 }
 0x248   : > { %837 = vadd.xlane.f32.xlu0 %v836_v44 }
 0x2d1   : > { %v838_v49 = vpop.xlane.xlu0 %837 }
 0x2d2   : > { %1328 = vrcp.f32 %v838_v49 }
 0x2df   : > { %v1329_v50 = vpop.eup %1328 }
 0x2e0   : > { %v840_v51 = vmul.f32 %v1329_v50, %v1327_v43 }
 0x2e2   : > { %1275 = vmatmul.mubr.msk.f32.vlgmr.msra.gmra.mxu1 %vm829_vm3, %v840_v51 }
 0x2e3   : > { %1278 = vmatpush3.msra.mxu1 %v915_v52  ;;  %1281 = vmatprep.mubr.msk.f32.mxu1 %vm1371_vm0, %v1370_v0 }
 0x2e4   : > { %1279 = vmatprep.subr.mxu1 %v1370_v0 }
 0x2e5   : > { %1280 = vmatpush3.msra.mxu1 %v914_v53 }
 0x3a2   : > { %v910_v54 = vpop.f32.mrf.mxu1 }
 0x3a3   : > { %1282 = vmatmul.mubr.msk.f32.vlgmr.msra.gmra.mxu1 %vm752_vm2, %v910_v54 }
 0x3a4   : > { %v1276_v55 = vpop.f32.mrf.mxu1 }
 0x461   : > { %992 = sbr.rel (%p1168_p7) target bundleno = 1128 (0x468), region = 64 }
 0x463   : > { %v985_v56 = vpop.f32.mrf.mxu1 }
 0x465   : > { %v1283_v57 = vpop.f32.mrf.mxu1 }
 0x466   : > { %v1169_v58 = vld [vmem:[%s1610_s9] ss:$0 sm:$0xff] }
 0x467   : > { %1000 = vst.msk [vmem:[%s1494_s11] sm:$0xff] %vm507_vm1, %v1169_v58 }
 0x468 PF:  {}
 0x46e   : > { %v1001_v59 = vld [vmem:[%s1494_s11] sm:$0xff] }
 0x46f   : > { %v1002_v60 = vadd.f32 %v1001_v59, %v985_v56 }
 0x471   : > { %1003 = vst.msk [vmem:[%s1494_s11] sm:$0xff] %vm507_vm1, %v1002_v60 }
 0x472 PF: > { %s20_s17 = sadd.s32 1, %s1368_s17   ;;  %s1612_s13 = smov %s1360_s15 }
 0x473   : > { %p17_p8 = scmp.ge.s32.totalorder %s20_s17, 10   ;;  %s1613_s14 = smov %s1364_s16 }
 0x474   : > { %s1614_s15 = smov %s1617_s18  ;;  %s1615_s16 = smov %s1621_s19 }
 0x475   :  { %19 = sbr.rel (!%p17_p8) target bundleno = 3 (0x3), region = 115 }

// kernel: semamba_code2dreat_forward.8
= control target key start
LH: loop header
LB: loop body
LE: loop exit
PB: predicated region body
PF: predicated region fallthrough
CT: control target
= control target key end

     0   :  { %s565_s24 = smov 0   ;;  %s604_s0 = inlined_call_operand.vmem [shape: f32[2,4,128], index: 0, kind: input, shape index: {}]   ;;  %s605_s1 = inlined_call_operand.vmem [shape: f32[2,8,128], index: 1, kind: input, shape index: {}]   ;;  %s606_s2 = inlined_call_operand.vmem [shape: f32[8,4], index: 2, kind: input, shape index: {}]   ;;  %s607_s3 = inlined_call_operand.vmem [shape: f32[8,1], index: 3, kind: input, shape index: {}]   ;;  %s608_s4 = inlined_call_operand.vmem [shape: f32[8,1], index: 4, kind: input, shape index: {}]   ;;  %s609_s5 = inlined_call_operand.vmem [shape: f32[8,1], index: 5, kind: input, shape index: {}]   ;;  %s610_s6 = inlined_call_operand.vmem [shape: f32[8,1], index: 6, kind: input, shape index: {}]   ;;  %s611_s7 = inlined_call_operand.vmem [shape: f32[2,8,128], index: 7, kind: output, shape index: {}]  }
   0x1 LB: > { %s480_s25 = sadd.s32 4294967295, %s520_s24   ;;  %p484_p0 = scmp.ge.s32.totalorder %s520_s24, 1  ;;  %s520_s24 = sphi %s565_s24, %s17_s24  }
   0x2   : > { %p245_p1 = scmp.lt.s32.totalorder %s520_s24, 3 }
   0x4   : > { %p246_p2 = pnand %p484_p0, %p245_p1 }
   0x5   : > { %p279_p3 = scmp.lt.s32.totalorder (!%p246_p2), %s480_s25, 1 }
   0x6   : > { %249 = sbr.rel (%p246_p2) target bundleno = 523 (0x20b), region = 48 }
   0xb   : > { %v522_v0 = vmov 0.0   ;;  %vm523_vm0 = vmmov 0   ;;  %v293_v1 = vld [vmem:[%s607_s3] sm:$0xff]  ;;  %s613_s25 = smov (!%p279_p3, %s480_s25), 1  ;;  %v524_v2 = vmov 0   ;;  %vm303_vm1 = vcmask 1043456  }
   0xc   : > { %494 = vmatprep.subr.mxu0 %v522_v0  ;;  %496 = vmatprep.mubr.msk.f32.mxu0 %vm523_vm0, %v522_v0  ;;  %s485_s28 = sshll.u32 %s613_s25, 2  ;;  %v292_v3 = vld [vmem:[%s606_s2] sm:$0xff]  ;;  %vm299_vm2 = vcmask 31744   ;;  %s486_s17 = sshll.u32 %s613_s25, 3 }
   0xd   : > { %510 = vset.pattern.permute.xlu0 %v524_v2  ;;  %511 = vset.pattern.permute.xlu1 %v524_v2  ;;  %s282_s8 = scalar_lea.vmem %s604_s0, %s485_s28  ;;  %v389_v5 = vld [vmem:[%s608_s4] sm:$0xff]  ;;  %s286_s20 = scalar_lea.vmem %s605_s1, %s486_s17 }
   0xe   : > { %296 = vperm.xlu0 %510, %v293_v1   ;;  %v291_v4 = vld [vmem:[%s282_s8] sm:$0xf]  ;;  %392 = vperm.xlu1 %511, %v389_v5   ;;  %s290_s23 = scalar_lea.vmem %s611_s7, %s486_s17 }
   0xf   : > { %495 = vmatpush3.msk.msra.mxu0 %vm303_vm1, %v291_v4  ;;  %v396_v6 = vld [vmem:[%s609_s5] sm:$0xff] }
  0x10   : > { %497 = vmatmul.mubr.msk.f32.vlgmr.msra.gmra.mxu0 %vm299_vm2, %v292_v3  ;;  %v404_v15 = vld [vmem:[%s610_s6] sm:$0xff] }
  0x11   : > { %v412_v26 = vld [vmem:[%s286_s20] sm:$0xff] }
  0x12   : > { %399 = vperm.xlu1 %511, %v396_v6  }
  0x89   : > { %v297_v7 = vpop.permute.xlu0 %296  ;;  %v393_v16 = vpop.permute.xlu1 %392 }
  0x8d   : > { %v400_v17 = vpop.permute.xlu1 %399 }
  0xd0   : > { %v373_v8 = vpop.f32.mrf.mxu0 }
  0xd1   : > { %v374_v9 = vadd.f32 %v373_v8, %v297_v7 }
  0xd2   : > { %v498_v10 = vpop.f32.mrf.mxu0 }
  0xd3   : > { %377 = vadd.xlane.f32.xlu0 %v374_v9 }
 0x15c   : > { %v378_v11 = vpop.xlane.xlu0 %377 }
 0x15d   : > { %v380_v12 = vmul.f32 0.0078125, %v378_v11 }
 0x15f   : > { %v381_v13 = vsub.f32 %v374_v9, %v380_v12 }
 0x161   : > { %v382_v14 = vmul.f32 %v381_v13, %v381_v13 }
 0x163   : > { %383 = vadd.xlane.f32.xlu1 %v382_v14 }
 0x174   : > { %407 = vperm.xlu1 %511, %v404_v15  }
 0x1ec   : > { %v384_v18 = vpop.xlane.xlu1 %383 }
 0x1ed   : > { %v385_v19 = vmul.f32 0.0078125, %v384_v18 }
 0x1ef   : > { %v386_v20 = vadd.f32 1e-05, %v385_v19 }
 0x1f0   : > { %v408_v25 = vpop.permute.xlu1 %407 }
 0x1f1   : > { %512 = vrsqrt.f32 %v386_v20 }
 0x1fe   : > { %v513_v21 = vpop.eup %512 }
 0x1ff   : > { %v388_v22 = vmul.f32 %v513_v21, %v381_v13 }
 0x201   : > { %v395_v23 = vmul.f32 %v393_v16, %v388_v22 }
 0x203   : > { %v402_v24 = vadd.f32 %v400_v17, %v395_v23 }
 0x205   : > { %vm403_vm3 = vcmp.ge.f32.partialorder %v402_v24, 0.0  ;;  %v410_v27 = vmul.f32 %v408_v25, %v402_v24 }
 0x207   : > { %v411_v28 = vsel %vm403_vm3, %v402_v24, %v410_v27 }
 0x208   : > { %v413_v29 = vadd.f32 %v412_v26, %v411_v28 }
 0x20a   : > { %414 = vst [vmem:[%s290_s23] sm:$0xff] %v413_v29 }
 0x20b PF: > { %s17_s24 = sadd.s32 1, %s520_s24  }
 0x20c   : > { %p14_p4 = scmp.ge.s32.totalorder %s17_s24, 4  }
 0x20e   :  { %16 = sbr.rel (!%p14_p4) target bundleno = 1 (0x1), region = 81 }

// kernel: semamba_code2dreat_forward.9
= control target key start
LH: loop header
LB: loop body
LE: loop exit
PB: predicated region body
PF: predicated region fallthrough
CT: control target
= control target key end

     0   :  { %s1028_s13 = smov 0   ;;  %s1030_s14 = smov 0   ;;  %s1114_s0 = inlined_call_operand.vmem [shape: f32[2,8,128], index: 0, kind: input, shape index: {}]   ;;  %s1115_s1 = inlined_call_operand.vmem [shape: f32[2,1,128], index: 1, kind: input, shape index: {}]   ;;  %s1116_s2 = inlined_call_operand.vmem [shape: f32[8,1], index: 2, kind: input, shape index: {}]   ;;  %s1117_s3 = inlined_call_operand.<no memory space> [shape: f32[1,1], index: 3, kind: input, shape index: {}]   ;;  %s1118_s4 = inlined_call_operand.vmem [shape: f32[8,1], index: 4, kind: input, shape index: {}]   ;;  %s1119_s6 = inlined_call_operand.vmem [shape: f32[2,1,128], index: 6, kind: output, shape index: {0}]   ;;  %s1120_s7 = inlined_call_operand.vmem [shape: f32[2,1,128], index: 7, kind: output, shape index: {1}]   ;;  %s1121_s8 = inlined_call_operand.vmem [shape: f32[2,1,128], index: 8, kind: output, shape index: {2}]   ;;  %s1122_s9 = inlined_call_operand.vmem [shape: f32[2,1,128], index: 9, kind: output, shape index: {3}]   ;;  %s1123_s5 = inlined_call_operand.<no memory space> [shape: f32[1,1], index: 5, kind: input, shape index: {}]  }
   0x1   :  { %v15_v0 = vstv %s1117_s3  ;;  %v17_v1 = vstv %s1123_s5  ;;  %s1032_s15 = smov 0  }
   0x2   :  { %16 = vst [vmem:[#allocation2] sm:$0x1] %v15_v0  ;;  %18 = vst [vmem:[#allocation3] sm:$0x1] %v17_v1 }
   0x3 LB: > { %s36_s3 = sadd.s32 1, %s959_s14  ;;  %p888_p0 = scmp.ge.s32.totalorder %s963_s15, 1  ;;  %s963_s15 = sphi %s1032_s15, %s24_s15   ;;  %s959_s14 = sphi %s1030_s14, %s1125_s14   ;;  %s955_s13 = sphi %s1028_s13, %s1124_s13  }
   0x4   : > { %p38_p1 = scmp.ge.s32.totalorder %s36_s3, 2  ;;  %p335_p2 = scmp.lt.s32.totalorder %s963_s15, 3 }
   0x6   : > { %s1127_s3 = smov (%p38_p1, %s36_s3), 0  ;;  %p336_p3 = pnand %p888_p0, %p335_p2 }
   0x7   : > { %p398_p4 = scmp.lt.s32.totalorder (!%p336_p3), %s955_s13, 1 }
   0x8   : > { %339 = sbr.rel (%p336_p3) target bundleno = 240 (0xf0), region = 44 }
   0xd   : > { %v460_v2 = vld [vmem:[%s1118_s4] sm:$0xff]  ;;  %v965_v4 = vmov 0   ;;  %s1129_s13 = smov (!%p398_p4, %s955_s13), 1  ;;  %v455_v11 = vlaneseq  ;;  %v966_v45 = vmov 683565275  }
   0xe   : > { %v436_v3 = vld [vmem:[%s1116_s2] sm:$0xff]  ;;  %935 = vset.pattern.permute.xlu0 %v965_v4  ;;  %936 = vset.pattern.permute.xlu1 %v965_v4  ;;  %s889_s19 = sshll.u32 %s1129_s13, 3  ;;  %s410_s25 = scalar_lea.vmem %s1115_s1, %s1129_s13  ;;  %v967_v47 = vmov 2475754826   ;;  %v968_v50 = vmov 2131351028  }
   0xf   : > { %463 = vperm.xlu0 %935, %v460_v2   ;;  %439 = vperm.xlu1 %936, %v436_v3   ;;  %v473_v5 = vld [vmem:[#allocation3] sm:$0x1]  ;;  %v449_v6 = vld [vmem:[#allocation2] sm:$0x1]  ;;  %s404_s22 = scalar_lea.vmem %s1114_s0, %s889_s19  ;;  %v456_v16 = vshrl.u32 %v455_v11, 7  ;;  %s422_s28 = scalar_lea.vmem %s1120_s7, %s1129_s13 }
  0x10   : > { %v435_v7 = vld [vmem:[%s404_s22] sm:$0xff]  ;;  %s416_s10 = scalar_lea.vmem %s1119_s6, %s1129_s13  ;;  %v969_v53 = vmov 2102212464   ;;  %v970_v56 = vmov 920167782   ;;  %s428_s5 = scalar_lea.vmem %s1121_s8, %s1129_s13 }
  0x11   : > { %v457_v22 = vsub.s32 0, %v456_v16  ;;  %v484_v31 = vld [vmem:[%s410_s25] sm:$0x1]  ;;  %v971_v59 = vmov 1326507024   ;;  %s434_s18 = scalar_lea.vmem %s1122_s9, %s1129_s13 }
  0x13   : > { %476 = vperm.xlu0 %935, %v473_v5   ;;  %452 = vperm.xlu1 %936, %v449_v6  }
  0x8a   : > { %v464_v8 = vpop.permute.xlu0 %463  ;;  %v440_v9 = vpop.permute.xlu1 %439 }
  0x8b   : > { %v466_v10 = vmul.f32 %v464_v8, %v435_v7  ;;  %v442_v12 = vmul.f32 %v440_v9, %v435_v7 }
  0x8d   : > { %v467_v13 = vrot.slane %v466_v10, 4  ;;  %v443_v14 = vrot.slane %v442_v12, 4 }
  0x8e   : > { %v453_v20 = vpop.permute.xlu1 %452  ;;  %v477_v24 = vpop.permute.xlu0 %476 }
  0x8f   : > { %v468_v15 = vadd.f32 %v467_v13, %v466_v10  ;;  %v444_v17 = vadd.f32 %v443_v14, %v442_v12  ;;  %v458_v27 = vrot.slane %v453_v20, %v457_v22  ;;  %v482_v29 = vrot.slane %v477_v24, %v457_v22 }
  0x91   : > { %v469_v18 = vrot.slane %v468_v15, 2  ;;  %v445_v19 = vrot.slane %v444_v17, 2 }
  0x93   : > { %v470_v21 = vadd.f32 %v469_v18, %v468_v15  ;;  %v446_v23 = vadd.f32 %v445_v19, %v444_v17 }
  0x95   : > { %v471_v25 = vrot.slane %v470_v21, 1  ;;  %v447_v26 = vrot.slane %v446_v23, 1 }
  0x97   : > { %v472_v28 = vadd.f32 %v471_v25, %v470_v21  ;;  %v448_v30 = vadd.f32 %v447_v26, %v446_v23 }
  0x99   : > { %v1066_v32 = vadd.f32 %v482_v29, %v472_v28  ;;  %v459_v33 = vadd.f32 %v458_v27, %v448_v30 }
  0x9b   : > { %487 = vst [vmem:[%s422_s28] sm:$0x1] %v1066_v32  ;;  %v491_v34 = vand.u32 2139095040, %v1066_v32  ;;  %v1074_v35 = vmul.f32 %v484_v31, %v459_v33  ;;  %v488_v39 = vand.u32 2147483647, %v1066_v32  ;;  %vm490_vm7 = vcmp.lt.s32.totalorder %v1066_v32, 0 }
  0x9c   : > { %vm580_vm15 = vweird.f32 %v1066_v32 }
  0x9d   : > { %v492_v36 = vshrl.u32 %v491_v34, 23  ;;  %486 = vst [vmem:[%s416_s10] sm:$0x1] %v1074_v35  ;;  %v495_v42 = vand.u32 8388607, %v488_v39  ;;  %vm489_vm8 = vcmp.le.f32.partialorder %v488_v39, 0.7853982 }
  0x9f   : > { %v890_v37 = vadd.s32 4294967169, %v492_v36  ;;  %v496_v61 = vor.u32 8388608, %v495_v42 }
  0xa1   : > { %v498_v38 = vadd.s32 1, %v890_v37  ;;  %v536_v11 = vshll.u32 %v496_v61, 8 }
  0xa3   : > { %vm499_vm0 = vcmp.gt.s32.totalorder %v498_v38, 0 }
  0xa4   : > { %v500_v40 = vsel %vm499_vm0, %v498_v38, 0 }
  0xa5   : > { %v502_v41 = vand.u32 31, %v500_v40  ;;  %v501_v44 = vshrl.u32 %v500_v40, 5 }
  0xa7   : > { %v503_v43 = vsub.s32 32, %v502_v41  ;;  %v505_v46 = vshll.u32 %v966_v45, %v502_v41  ;;  %v508_v48 = vshll.u32 %v967_v47, %v502_v41  ;;  %v511_v52 = vshll.u32 %v968_v50, %v502_v41 }
  0xa8   : > { %v514_v55 = vshll.u32 %v969_v53, %v502_v41  ;;  %v517_v58 = vshll.u32 %v970_v56, %v502_v41  ;;  %vm520_vm1 = vcmp.lt.s32.totalorder %v501_v44, 1  ;;  %vm523_vm2 = vcmp.lt.s32.totalorder %v501_v44, 4 }
  0xa9   : > { %v506_v49 = vshrl.u32 %v967_v47, %v503_v43  ;;  %v509_v51 = vshrl.u32 %v968_v50, %v503_v43  ;;  %v512_v54 = vshrl.u32 %v969_v53, %v503_v43  ;;  %v515_v57 = vshrl.u32 %v970_v56, %v503_v43 }
  0xaa   : > { %v518_v60 = vshrl.u32 %v971_v59, %v503_v43  ;;  %v504_v6 = vshrl.u32 %v966_v45, %v503_v43  ;;  %vm522_vm3 = vcmp.lt.s32.totalorder %v501_v44, 3  ;;  %vm521_vm4 = vcmp.lt.s32.totalorder %v501_v44, 2 }
  0xab   : > { %v507_v62 = vor.u32 %v506_v49, %v505_v46  ;;  %v510_v63 = vor.u32 %v509_v51, %v508_v48  ;;  %v513_v0 = vor.u32 %v512_v54, %v511_v52  ;;  %v516_v1 = vor.u32 %v515_v57, %v514_v55 }
  0xac   : > { %v519_v2 = vor.u32 %v518_v60, %v517_v58 }
  0xad   : > { %v525_v3 = vsel %vm523_vm2, %v513_v0, 2102212464  ;;  %v528_v4 = vsel %vm520_vm1, %v507_v62, %v510_v63  ;;  %v532_v5 = vsel %vm520_vm1, %v510_v63, %v513_v0  ;;  %v529_v7 = vsel %vm523_vm2, %v516_v1, 920167782 }
  0xae   : > { %v533_v8 = vsel %vm523_vm2, %v519_v2, 1326507024  ;;  %v530_v9 = vsel %vm522_vm3, %v513_v0, %v529_v7  ;;  %v524_v12 = vsel %vm520_vm1, %v504_v6, %v507_v62  ;;  %v526_v13 = vsel %vm522_vm3, %v510_v63, %v525_v3 }
  0xaf   : > { %v534_v10 = vsel %vm522_vm3, %v516_v1, %v533_v8  ;;  %v531_v14 = vsel %vm521_vm4, %v528_v4, %v530_v9  ;;  %v527_v20 = vsel %vm521_vm4, %v524_v12, %v526_v13 }
  0xb0   : > { %v535_v15 = vsel %vm521_vm4, %v532_v5, %v534_v10  ;;  %v1083_v18 = vmul.u32.u64.low %v536_v11, %v531_v14  ;;  %v1084_v19 = vmul.u32.u64.high %v536_v11, %v531_v14, %v1083_v18  ;;  %v543_v22 = vmul.u32 %v536_v11, %v527_v20 }
  0xb1   : > { %v1080_v16 = vmul.u32.u64.low %v536_v11, %v535_v15  ;;  %v1081_v17 = vmul.u32.u64.high %v536_v11, %v535_v15, %v1080_v16 }
  0xb2   : > { %v546_v21 = vadd.s32 1, %v1084_v19 }
  0xb3   : > { %vm545_vm5 = vc.u32 %v1081_v17, %v1083_v18  ;;  %v544_v36 = vadd.s32 %v1083_v18, %v1081_v17 }
  0xb4   : > { %v547_v23 = vsel %vm545_vm5, %v546_v21, %v1084_v19 }
  0xb5   : > { %v548_v24 = vadd.s32 %v547_v23, %v543_v22 }
  0xb7   : > { %v549_v25 = vadd.s32 536870912, %v548_v24 }
  0xb9   : > { %v550_v26 = vshrl.u32 %v549_v25, 30 }
  0xbb   : > { %v551_v27 = vshll.u32 %v550_v26, 30  ;;  %v574_v50 = vsub.s32 4, %v550_v26 }
  0xbd   : > { %v552_v28 = vsub.s32 %v548_v24, %v551_v27  ;;  %v575_v53 = vsel %vm490_vm7, %v574_v50, %v550_v26 }
  0xbe   : > { %v577_v54 = vsel %vm489_vm8, 0, %v575_v53 }
  0xbf   : > { %v554_v29 = vsub.s32 0, %v552_v28  ;;  %v686_v55 = vadd.s32 3, %v577_v54  ;;  %v581_v56 = vand.u32 3, %v577_v54 }
  0xc1   : > { %v891_v30 = vmin.u32 %v554_v29, %v552_v28  ;;  %v687_v57 = vand.u32 3, %v686_v55  ;;  %vm586_vm9 = vcmp.eq.s32.totalorder %v581_v56, 2  ;;  %vm583_vm11 = vcmp.eq.s32.totalorder %v581_v56, 0 }
  0xc2   : > { %vm582_vm13 = vcmp.lt.s32.totalorder %v581_v56, 2 }
  0xc3   : > { %v556_v31 = vclz %v891_v30  ;;  %vm692_vm10 = vcmp.eq.s32.totalorder %v687_v57, 2  ;;  %vm689_vm12 = vcmp.eq.s32.totalorder %v687_v57, 0  ;;  %vm688_vm14 = vcmp.lt.s32.totalorder %v687_v57, 2 }
  0xc5   : > { %v892_v33 = vadd.s32 4294967294, %v556_v31 }
  0xc7   : > { %vm893_vm6 = vcmp.lt.s32.totalorder %v892_v33, 0 }
  0xc8   : > { %v559_v34 = vsel %vm893_vm6, 0, %v892_v33 }
  0xc9   : > { %v560_v37 = vsub.s32 32, %v559_v34  ;;  %v564_v38 = vsub.s32 4294967266, %v559_v34  ;;  %v561_v40 = vshll.u32 %v552_v28, %v559_v34 }
  0xcb   : > { %v562_v41 = vshrl.u32 %v544_v36, %v560_v37  ;;  %v565_v42 = vadd.s32 127, %v564_v38 }
  0xcd   : > { %v563_v43 = vor.u32 %v562_v41, %v561_v40  ;;  %v566_v44 = vshll.u32 %v565_v42, 23 }
  0xcf   : > { %v567_v45 = vor.u32 4788187, %v566_v44  ;;  %v570_v47 = vcvt.s32.f32 %v563_v43 }
  0xd1   : > { %v568_v46 = vand.u32 2147483647, %v567_v45 }
  0xd3   : > { %v571_v48 = vmul.f32 %v570_v47, %v568_v46 }
  0xd5   : > { %v572_v49 = vxor.u32 2147483648, %v571_v48 }
  0xd7   : > { %v573_v51 = vsel %vm490_vm7, %v572_v49, %v571_v48 }
  0xd8   : > { %v576_v52 = vsel %vm489_vm8, %v1066_v32, %v573_v51 }
  0xd9   : > { %937 = vcosq.f32 %v576_v52 }
  0xda   : > { %939 = vsinq.f32 %v576_v52 }
  0xe6   : > { %v938_v58 = vpop.eup %937 }
  0xe7   : > { %v940_v59 = vpop.eup %939  ;;  %v587_v60 = vxor.u32 2147483648, %v938_v58 }
  0xe8   : > { %v584_v61 = vxor.u32 2147483648, %v940_v59 }
  0xe9   : > { %v588_v62 = vsel %vm586_vm9, %v587_v60, %v940_v59  ;;  %v694_v39 = vsel %vm692_vm10, %v587_v60, %v940_v59 }
  0xea   : > { %v585_v63 = vsel %vm583_vm11, %v938_v58, %v584_v61  ;;  %v691_v0 = vsel %vm689_vm12, %v938_v58, %v584_v61 }
  0xeb   : > { %v589_v1 = vsel %vm582_vm13, %v585_v63, %v588_v62  ;;  %v695_v2 = vsel %vm688_vm14, %v691_v0, %v694_v39 }
  0xec   : > { %v590_v3 = vsel %vm580_vm15, nan, %v589_v1  ;;  %v696_v4 = vsel %vm580_vm15, nan, %v695_v2 }
  0xed   : > { %v591_v5 = vmul.f32 %v590_v3, %v1074_v35  ;;  %v697_v6 = vmul.f32 %v696_v4, %v1074_v35 }
  0xef   : > { %592 = vst [vmem:[%s428_s5] sm:$0x1] %v591_v5  ;;  %698 = vst [vmem:[%s434_s18] sm:$0x1] %v697_v6 }
  0xf0 PF: > { %s24_s15 = sadd.s32 1, %s963_s15   ;;  %s1124_s13 = smov %s959_s14 }
  0xf1   : > { %p21_p5 = scmp.ge.s32.totalorder %s24_s15, 4   ;;  %s1125_s14 = smov %s1127_s3 }
  0xf3   :  { %23 = sbr.rel (!%p21_p5) target bundleno = 3 (0x3), region = 113 }

</bundles_post_ra>
